<compile_context>
chip_gen: v7x
topology: tpu7x:2x2x1
jax: 0.10.0
libtpu: 0.0.40
codegen_flags: <defaults>
</compile_context>

<pallas_src>
import jax
import jax.numpy as jnp
from jax import lax
from jax.experimental import pallas as pl
from jax.experimental.pallas import tpu as pltpu

_INV_SQRT2 = 0.7071067811865476


def _nr_reciprocal(x):
    """EUP approximate reciprocal refined with one Newton step."""
    r = pl.reciprocal(x, approx=True)
    return r * (2.0 - x * r)


def _structural_attention_kernel(x_ref, s_arc_ref, s_rel_ref, mask_ref,
                                 wp_t_ref, bp_ref, wd_ref, bd_ref,
                                 out_ref, m_ref, l_ref, acc_ref):
    bt, n, jt, num_labels = s_rel_ref.shape
    rows = bt * n
    proj = wp_t_ref.shape[1]
    h_out = wd_ref.shape[1]
    assert wd_ref.shape[0] == num_labels * proj
    jb = pl.program_id(1)

    # ---- init online-softmax state on the first j tile of each batch block --
    @pl.when(jb == 0)
    def _():
        m_ref[...] = jnp.full_like(m_ref, -jnp.inf)
        l_ref[...] = jnp.zeros_like(l_ref)
        acc_ref[...] = jnp.zeros_like(acc_ref)

    # ---- per-tile softmax math (f32; logits arrive bf16) --------------------
    s_arc = s_arc_ref[...].astype(jnp.float32)               # (Bt, N, jt)
    s_rel = s_rel_ref[...].astype(jnp.float32)               # (Bt, N, jt, L)

    # label softmax over k (last axis), local to each head position j
    e_r = jnp.exp(s_rel - jnp.max(s_rel, axis=-1, keepdims=True))
    inv_r = _nr_reciprocal(jnp.sum(e_r, axis=-1))             # (Bt, N, jt)

    # online arc softmax over the tiled reduction axis j
    m_prev = m_ref[...]                                       # (Bt, N, 1)
    m_new = jnp.maximum(m_prev, jnp.max(s_arc, axis=-1, keepdims=True))
    alpha = jnp.exp(m_prev - m_new)                           # (Bt, N, 1)
    e_a = jnp.exp(s_arc - m_new)                              # (Bt, N, jt)
    l_ref[...] = alpha * l_ref[...] + jnp.sum(e_a, axis=-1, keepdims=True)
    # fold the label-softmax denominator into the arc weight: one (Bt,N,jt)
    # multiply instead of a full (Bt,N,jt,L) one
    w = e_a * inv_r                                           # (Bt, N, jt)
    acc_ref[...] = alpha * acc_ref[...] + jnp.sum(w[..., None] * e_r, axis=2)
    m_ref[...] = m_new

    # ---- epilogue on the last j tile: projection, dense, GELU ---------------
    @pl.when(jb == pl.num_programs(1) - 1)
    def _():
        inv_l = _nr_reciprocal(l_ref[...])                    # (Bt, N, 1)
        a_sum = (acc_ref[...] * inv_l * mask_ref[...]).reshape(rows, num_labels)

        # projection: x @ Wp^T + bp  (bf16 MXU operands, f32 accumulation)
        xp = jnp.dot(x_ref[...].astype(jnp.bfloat16), wp_t_ref[...],
                     preferred_element_type=jnp.float32) + bp_ref[...]
        xp_bf = xp.astype(jnp.bfloat16)

        # Label contraction + dense layer WITHOUT the zero-padded expand-matrix
        # matmul / jnp.tile of the previous version: one (rows,P)@(P,H_out)
        # bf16 MXU panel per label, scaled by its arc-weighted label
        # probability and accumulated in f32 (identical math to dense(flatten(AxW))).
        # TODO(synk): at production sizes (P>=128, H_out a multiple of 256) a
        # single fused (rows, L*P) @ (L*P, H_out) matmul fills the MXU better;
        # switch once the (rows,L,P)->(rows,L*P) relayout is verified cheap in
        # the bundle dump.
        pre = jnp.zeros((rows, h_out), jnp.float32)
        for k in range(num_labels):
            w_k = wd_ref[k * proj:(k + 1) * proj, :]          # (P, H_out) panel
            q_k = jnp.dot(xp_bf, w_k, preferred_element_type=jnp.float32)
            pre = pre + a_sum[:, k:k + 1] * q_k
        pre = pre + bd_ref[...]

        # exact (erf) GELU, matching torch.nn.GELU() default semantics
        out = 0.5 * pre * (1.0 + lax.erf(pre * _INV_SQRT2))
        out_ref[...] = out.astype(out_ref.dtype)


def prepare_params(params, compute_dtype=jnp.bfloat16):
    """One-time weight preparation. Do NOT re-run this per step under jit."""
    wp, bp = params["proj_w"], params["proj_b"]               # (P, H), (P,)
    wv = params["head_WV"]                                    # (L, P, P)
    wd, bd = params["dense_w"], params["dense_b"]             # (H_out, P*L), (H_out,)
    L, P, _ = wv.shape
    H = wp.shape[1]
    H_out = wd.shape[0]

    # einsum('bihk,khm->bihk', Ax, WV) only needs sum_m WV[k,h,m]
    w_sum = jnp.sum(wv.astype(jnp.float32), axis=-1)          # (L, P)
    # PyTorch flatten(2) of (B,N,H,K) is h-major / k-minor: Wd[o, h*L+k].
    # Permute to k-major rows and pre-scale by w_sum so the kernel only slices
    # per-label (P, H_out) panels:
    #   wd_scaled[k*P+h, o] = w_sum[k, h] * Wd[o, h*L+k]
    wd_perm = jnp.transpose(wd.astype(jnp.float32).reshape(H_out, P, L),
                            (2, 1, 0)).reshape(L * P, H_out)
    wd_scaled = (w_sum.reshape(L * P, 1) * wd_perm).astype(compute_dtype)

    return {
        "wp_t": wp.T.astype(compute_dtype),                   # (H, P)
        "bp": bp.astype(jnp.float32).reshape(1, P),
        "wd_scaled": wd_scaled,                               # (L*P, H_out)
        "bd": bd.astype(jnp.float32).reshape(1, H_out),
        "dims": (L, P, H, H_out),
    }


def _vmem_limit_bytes():
    """Per-generation VMEM limit: ~100 MiB on v5e/v6e, ~51 MiB on v7x."""
    try:
        info = pltpu.get_tpu_info()
        cap = int(getattr(info, "vmem_capacity_bytes", 64 * 1024 * 1024))
    except Exception:
        cap = 64 * 1024 * 1024
    return min(100 * 1024 * 1024, int(cap * 0.8))


def _pick_tiles(B, N, L, vmem_limit):
    """VMEM-budget-driven (batch_tile, j_tile) choice."""
    # j sits on the lane axis of s_arc and the second-minor axis of s_rel:
    # the tile must be a multiple of 128 or the full score length N.
    if N % 128 == 0 and N > 128:
        jt_opts = [j for j in (512, 256, 128) if j <= N and N % j == 0]
    else:
        jt_opts = [N]
    budget = 0.4 * vmem_limit   # leave room for weights, x/out blocks, scratch
    for jt in jt_opts:
        for bt in range(B, 0, -1):
            if B % bt != 0:
                continue
            if B >= 2 and B // bt < 2:
                continue   # keep >= 2 blocks on the parallel axis (v7x 2nd TC)
            rel = bt * N * jt * L
            arc = bt * N * jt
            # bf16 blocks double-buffered + one f32 temporary each
            est = rel * (2 * 2 + 4) + arc * (2 * 2 + 3 * 4)
            if est <= budget:
                return bt, jt
    return 1, jt_opts[-1]


def structural_attention_layer(x, s_arc, s_rel, mask, prepared,
                               *, batch_tile=None, j_tile=None):
    """Pallas forward of StructuralAttentionLayer (with projection).

    x:      (B, N, H)     hidden states
    s_arc:  (B, N, N)     arc logits   (softmax over the last axis)
    s_rel:  (B, N, N, L)  label logits in their NATURAL layout (softmax over L)
    mask:   (B, N)        query-position mask (multiplies p_arc)
    prepared: output of prepare_params(params)
    """
    L, P, H, H_out = prepared["dims"]
    B, N, _ = x.shape
    assert x.shape[-1] == H and s_rel.shape == (B, N, N, L)

    vmem_limit = _vmem_limit_bytes()
    auto_bt, auto_jt = _pick_tiles(B, N, L, vmem_limit)
    bt = batch_tile or auto_bt
    jt = j_tile or auto_jt
    assert B % bt == 0 and N % jt == 0
    n_batch, n_j = B // bt, N // jt
    rows_blk = bt * N

    # DMA the big logits in bf16; softmax math stays f32 in-kernel.
    # TODO(synk): have the upstream biaffine producer emit bf16 directly so
    # this cast is not an extra HBM round trip under jit.
    s_arc_c = s_arc.astype(jnp.bfloat16)
    s_rel_c = s_rel.astype(jnp.bfloat16)
    x2d = x.reshape(B * N, H)                                 # free reshape
    mask3 = mask.reshape(B, N, 1).astype(jnp.float32)

    wp_t, bp = prepared["wp_t"], prepared["bp"]
    wd_scaled, bd = prepared["wd_scaled"], prepared["bd"]

    def build(single_buffer_weights):
        def wspec(shape):
            kwargs = {}
            if single_buffer_weights:
                # Grid-invariant operands: no double buffering. VMEM headroom
                # (wd_scaled alone is ~14 MB at production size on v7x).
                kwargs["pipeline_mode"] = pl.Buffered(1)
            return pl.BlockSpec(shape, lambda b, j: (0, 0), **kwargs)

        grid_spec = pltpu.PrefetchScalarGridSpec(
            num_scalar_prefetch=0,
            grid=(n_batch, n_j),                              # reduction axis last
            in_specs=[
                pl.BlockSpec((rows_blk, H), lambda b, j: (b, 0)),         # x rows
                pl.BlockSpec((bt, N, jt), lambda b, j: (b, 0, j)),        # s_arc
                pl.BlockSpec((bt, N, jt, L), lambda b, j: (b, 0, j, 0)),  # s_rel
                pl.BlockSpec((bt, N, 1), lambda b, j: (b, 0, 0)),         # mask
                wspec((H, P)),                                            # Wp^T
                wspec((1, P)),                                            # bp
                wspec((L * P, H_out)),                                    # Wd (perm+scaled)
                wspec((1, H_out)),                                        # bd
            ],
            # Row-merged (B*N, H_out) output slab: lane-dense for real hidden
            # sizes (>=128); written once per batch block on the last j step.
            # TODO(synk): if a narrow H_out (<128) is ever a real config, pack
            # several row blocks into one lane-dense slab before storing.
            out_specs=pl.BlockSpec((rows_blk, H_out), lambda b, j: (b, 0)),
            scratch_shapes=[
                pltpu.VMEM((bt, N, 1), jnp.float32),   # running arc max m
                pltpu.VMEM((bt, N, 1), jnp.float32),   # running arc denom l
                pltpu.VMEM((bt, N, L), jnp.float32),   # a_sum accumulator
            ],
        )
        return pl.pallas_call(
            _structural_attention_kernel,
            out_shape=jax.ShapeDtypeStruct((B * N, H_out), x.dtype),
            grid_spec=grid_spec,
            compiler_params=pltpu.CompilerParams(
                dimension_semantics=("parallel", "arbitrary"),
                vmem_limit_bytes=vmem_limit),
        )

    args = (x2d, s_arc_c, s_rel_c, mask3, wp_t, bp, wd_scaled, bd)
    try:
        out2d = build(True)(*args)
        out2d.block_until_ready()   # surface any lowering/runtime issue here
    except Exception:
        # Fallback for JAX builds where pipeline_mode=pl.Buffered(1) is not
        # supported on pallas_call BlockSpecs (numerics are identical).
        out2d = build(False)(*args)

    return out2d.reshape(B, N, H_out)


def reference(x, s_arc, s_rel, mask, params):
    """Pure-JAX transcription of the PyTorch forward, for verification."""
    wp, bp = params["proj_w"], params["proj_b"]
    wv = params["head_WV"]
    wd, bd = params["dense_w"], params["dense_b"]
    p_arc = jax.nn.softmax(s_arc, axis=-1) * mask[..., None]
    p_rel = jax.nn.softmax(s_rel, axis=-1)
    A = p_arc[..., None] * p_rel
    xp = x @ wp.T + bp
    Ax = jnp.einsum("bijk,bih->bihk", A, xp)
    AxW = jnp.einsum("bihk,khm->bihk", Ax, wv)
    flat = AxW.reshape(AxW.shape[0], AxW.shape[1], -1)
    out = flat @ wd.T + bd
    return jax.nn.gelu(out, approximate=False)


if __name__ == "__main__":
    # Small config: hidden=32, projection=16, num_ud_labels=4, seq=8, batch=2
    B, N, HIDDEN, PROJ, NUM_LABELS = 2, 8, 32, 16, 4

    key = jax.random.PRNGKey(0)
    ks = jax.random.split(key, 8)

    params = {
        "proj_w": 0.1 * jax.random.normal(ks[3], (PROJ, HIDDEN), jnp.float32),
        "proj_b": 0.1 * jax.random.normal(ks[4], (PROJ,), jnp.float32),
        "head_WV": jax.random.normal(ks[5], (NUM_LABELS, PROJ, PROJ), jnp.float32),
        "dense_w": 0.1 * jax.random.normal(ks[6], (HIDDEN, PROJ * NUM_LABELS), jnp.float32),
        "dense_b": 0.1 * jax.random.normal(ks[7], (HIDDEN,), jnp.float32),
    }
    prepared = prepare_params(params)   # one-time weight preparation

    # ---- test 1: toy shapes (single j tile) ---------------------------------
    x = jax.random.normal(ks[0], (B, N, HIDDEN), dtype=jnp.float32)
    s_arc = jax.random.normal(ks[1], (B, N, N), dtype=jnp.float32)
    s_rel = jax.random.normal(ks[2], (B, N, N, NUM_LABELS), dtype=jnp.float32)
    lengths = jnp.array([N, N - 3], dtype=jnp.int32)
    mask = (jnp.arange(N)[None, :] < lengths[:, None]).astype(jnp.float32)

    out = structural_attention_layer(x, s_arc, s_rel, mask, prepared)
    out = jax.block_until_ready(out)
    ref = reference(x, s_arc, s_rel, mask, params)
    assert out.shape == (B, N, HIDDEN), out.shape
    # bf16 logit DMA + bf16 MXU operands dominate the error budget; the softmax
    # reciprocals are Newton-refined and contribute ~1e-6.
    err1 = float(jnp.max(jnp.abs(out - ref)))
    assert jnp.allclose(out, ref, rtol=2e-2, atol=2e-2), err1

    # ---- test 2: longer sequence, forced j_tile=128 -> exercises the online
    # (flash-style) arc softmax across multiple reduction steps --------------
    N2 = 256
    kb = jax.random.split(jax.random.PRNGKey(1), 3)
    x2 = jax.random.normal(kb[0], (B, N2, HIDDEN), dtype=jnp.float32)
    s_arc2 = jax.random.normal(kb[1], (B, N2, N2), dtype=jnp.float32)
    s_rel2 = jax.random.normal(kb[2], (B, N2, N2, NUM_LABELS), dtype=jnp.float32)
    lengths2 = jnp.array([N2, N2 - 56], dtype=jnp.int32)
    mask2 = (jnp.arange(N2)[None, :] < lengths2[:, None]).astype(jnp.float32)

    out2 = structural_attention_layer(x2, s_arc2, s_rel2, mask2, prepared,
                                      j_tile=128)
    out2 = jax.block_until_ready(out2)
    ref2 = reference(x2, s_arc2, s_rel2, mask2, params)
    err2 = float(jnp.max(jnp.abs(out2 - ref2)))
    assert jnp.allclose(out2, ref2, rtol=2e-2, atol=2e-2), err2

    print("KERNEL_OK")
</pallas_src>

<mosaic_0001>
module attributes {stable_mosaic.version = 11 : i64} {
  func.func @_structural_attention_kernel(%arg0: i32, %arg1: i32, %arg2: memref<8x32xf32, #tpu.memory_space<vmem>>, %arg3: memref<1x8x8xbf16, #tpu.memory_space<vmem>>, %arg4: memref<1x8x8x4xbf16, #tpu.memory_space<vmem>>, %arg5: memref<1x8x1xf32, #tpu.memory_space<vmem>>, %arg6: memref<32x16xbf16, #tpu.memory_space<vmem>>, %arg7: memref<1x16xf32, #tpu.memory_space<vmem>>, %arg8: memref<64x32xbf16, #tpu.memory_space<vmem>>, %arg9: memref<1x32xf32, #tpu.memory_space<vmem>>, %arg10: memref<8x32xf32, #tpu.memory_space<vmem>>, %arg11: memref<1x8x1xf32, #tpu.memory_space<vmem>>, %arg12: memref<1x8x1xf32, #tpu.memory_space<vmem>>, %arg13: memref<1x8x4xf32, #tpu.memory_space<vmem>>) attributes {dimension_semantics = [#tpu.dimension_semantics<parallel>, #tpu.dimension_semantics<arbitrary>], iteration_bounds = array<i64: 2, 1>, scalar_prefetch = 0 : i64, scratch_operands = 3 : i64, tpu.core_type = #tpu.core_type<tc>, window_params = [{transform_indices = @transform_0, window_bounds = array<i64: 8, 32>}, {transform_indices = @transform_1, window_bounds = array<i64: 1, 8, 8>}, {transform_indices = @transform_2, window_bounds = array<i64: 1, 8, 8, 4>}, {transform_indices = @transform_3, window_bounds = array<i64: 1, 8, 1>}, {pipeline_mode = #tpu.pipeline_mode<synchronous>, transform_indices = @transform_4, window_bounds = array<i64: 32, 16>}, {pipeline_mode = #tpu.pipeline_mode<synchronous>, transform_indices = @transform_5, window_bounds = array<i64: 1, 16>}, {pipeline_mode = #tpu.pipeline_mode<synchronous>, transform_indices = @transform_6, window_bounds = array<i64: 64, 32>}, {pipeline_mode = #tpu.pipeline_mode<synchronous>, transform_indices = @transform_7, window_bounds = array<i64: 1, 32>}, {transform_indices = @transform_8, window_bounds = array<i64: 8, 32>}]} {
    %c0_i32 = arith.constant 0 : i32
    %0 = arith.cmpi eq, %arg1, %c0_i32 : i32
    %1 = arith.extui %0 : i1 to i32
    %c0_i32_0 = arith.constant 0 : i32
    %2 = arith.cmpi ne, %1, %c0_i32_0 : i32
    scf.if %2 {
      %cst_32 = arith.constant 0xFF800000 : f32
      %47 = vector.broadcast %cst_32 : f32 to vector<1x8x1xf32>
      %c0_33 = arith.constant 0 : index
      %c0_34 = arith.constant 0 : index
      %c0_35 = arith.constant 0 : index
      %48 = vector.load %arg11[%c0_33, %c0_34, %c0_35] : memref<1x8x1xf32, #tpu.memory_space<vmem>>, vector<1x8x1xf32>
      tpu.vector_store %arg11[%c0_33, %c0_34, %c0_35], %47 {strides = array<i32>} : memref<1x8x1xf32, #tpu.memory_space<vmem>>, vector<1x8x1xf32>,
      %cst_36 = arith.constant 0.000000e+00 : f32
      %49 = vector.broadcast %cst_36 : f32 to vector<1x8x1xf32>
      %c0_37 = arith.constant 0 : index
      %c0_38 = arith.constant 0 : index
      %c0_39 = arith.constant 0 : index
      %50 = vector.load %arg12[%c0_37, %c0_38, %c0_39] : memref<1x8x1xf32, #tpu.memory_space<vmem>>, vector<1x8x1xf32>
      tpu.vector_store %arg12[%c0_37, %c0_38, %c0_39], %49 {strides = array<i32>} : memref<1x8x1xf32, #tpu.memory_space<vmem>>, vector<1x8x1xf32>,
      %cst_40 = arith.constant 0.000000e+00 : f32
      %51 = vector.broadcast %cst_40 : f32 to vector<1x8x4xf32>
      %c0_41 = arith.constant 0 : index
      %c0_42 = arith.constant 0 : index
      %c0_43 = arith.constant 0 : index
      %52 = vector.load %arg13[%c0_41, %c0_42, %c0_43] : memref<1x8x4xf32, #tpu.memory_space<vmem>>, vector<1x8x4xf32>
      tpu.vector_store %arg13[%c0_41, %c0_42, %c0_43], %51 {strides = array<i32>} : memref<1x8x4xf32, #tpu.memory_space<vmem>>, vector<1x8x4xf32>,
    } else {
    }
    %c0 = arith.constant 0 : index
    %c0_1 = arith.constant 0 : index
    %c0_2 = arith.constant 0 : index
    %3 = vector.load %arg3[%c0, %c0_1, %c0_2] : memref<1x8x8xbf16, #tpu.memory_space<vmem>>, vector<1x8x8xbf16>
    %4 = arith.extf %3 : vector<1x8x8xbf16> to vector<1x8x8xf32>
    %c0_3 = arith.constant 0 : index
    %c0_4 = arith.constant 0 : index
    %c0_5 = arith.constant 0 : index
    %c0_6 = arith.constant 0 : index
    %5 = vector.load %arg4[%c0_3, %c0_4, %c0_5, %c0_6] : memref<1x8x8x4xbf16, #tpu.memory_space<vmem>>, vector<1x8x8x4xbf16>
    %6 = arith.extf %5 : vector<1x8x8x4xbf16> to vector<1x8x8x4xf32>
    %cst = arith.constant dense<0xFF800000> : vector<1x8x8xf32>
    %7 = vector.multi_reduction <maximumf>, %6, %cst [3] : vector<1x8x8x4xf32> to vector<1x8x8xf32>
    %8 = vector.shape_cast %7 : vector<1x8x8xf32> to vector<1x8x8x1xf32>
    %9 = vector.broadcast %8 : vector<1x8x8x1xf32> to vector<1x8x8x4xf32>
    %10 = arith.subf %6, %9 : vector<1x8x8x4xf32>
    %11 = math.exp %10 : vector<1x8x8x4xf32>
    %cst_7 = arith.constant dense<0.000000e+00> : vector<1x8x8xf32>
    %12 = vector.multi_reduction <add>, %11, %cst_7 [3] : vector<1x8x8x4xf32> to vector<1x8x8xf32>
    %13 = tpu.reciprocal %12 {approx = true} : vector<1x8x8xf32> -> vector<1x8x8xf32>
    %14 = arith.mulf %12, %13 : vector<1x8x8xf32>
    %cst_8 = arith.constant 2.000000e+00 : f32
    %15 = vector.broadcast %cst_8 : f32 to vector<1x8x8xf32>
    %16 = arith.subf %15, %14 : vector<1x8x8xf32>
    %17 = arith.mulf %13, %16 : vector<1x8x8xf32>
    %c0_9 = arith.constant 0 : index
    %c0_10 = arith.constant 0 : index
    %c0_11 = arith.constant 0 : index
    %18 = vector.load %arg11[%c0_9, %c0_10, %c0_11] : memref<1x8x1xf32, #tpu.memory_space<vmem>>, vector<1x8x1xf32>
    %cst_12 = arith.constant dense<0xFF800000> : vector<1x8xf32>
    %19 = vector.multi_reduction <maximumf>, %4, %cst_12 [2] : vector<1x8x8xf32> to vector<1x8xf32>
    %20 = vector.shape_cast %19 : vector<1x8xf32> to vector<1x8x1xf32>
    %21 = arith.maximumf %18, %20 : vector<1x8x1xf32>
    %22 = arith.subf %18, %21 : vector<1x8x1xf32>
    %23 = math.exp %22 : vector<1x8x1xf32>
    %24 = vector.broadcast %21 : vector<1x8x1xf32> to vector<1x8x8xf32>
    %25 = arith.subf %4, %24 : vector<1x8x8xf32>
    %26 = math.exp %25 : vector<1x8x8xf32>
    %c0_13 = arith.constant 0 : index
    %c0_14 = arith.constant 0 : index
    %c0_15 = arith.constant 0 : index
    %27 = vector.load %arg12[%c0_13, %c0_14, %c0_15] : memref<1x8x1xf32, #tpu.memory_space<vmem>>, vector<1x8x1xf32>
    %28 = arith.mulf %23, %27 : vector<1x8x1xf32>
    %cst_16 = arith.constant dense<0.000000e+00> : vector<1x8xf32>
    %29 = vector.multi_reduction <add>, %26, %cst_16 [2] : vector<1x8x8xf32> to vector<1x8xf32>
    %30 = vector.shape_cast %29 : vector<1x8xf32> to vector<1x8x1xf32>
    %31 = arith.addf %28, %30 : vector<1x8x1xf32>
    %c0_17 = arith.constant 0 : index
    %c0_18 = arith.constant 0 : index
    %c0_19 = arith.constant 0 : index
    %32 = vector.load %arg12[%c0_17, %c0_18, %c0_19] : memref<1x8x1xf32, #tpu.memory_space<vmem>>, vector<1x8x1xf32>
    tpu.vector_store %arg12[%c0_17, %c0_18, %c0_19], %31 {strides = array<i32>} : memref<1x8x1xf32, #tpu.memory_space<vmem>>, vector<1x8x1xf32>,
    %33 = arith.mulf %26, %17 : vector<1x8x8xf32>
    %c0_20 = arith.constant 0 : index
    %c0_21 = arith.constant 0 : index
    %c0_22 = arith.constant 0 : index
    %34 = vector.load %arg13[%c0_20, %c0_21, %c0_22] : memref<1x8x4xf32, #tpu.memory_space<vmem>>, vector<1x8x4xf32>
    %35 = vector.broadcast %23 : vector<1x8x1xf32> to vector<1x8x4xf32>
    %36 = arith.mulf %35, %34 : vector<1x8x4xf32>
    %37 = vector.shape_cast %33 : vector<1x8x8xf32> to vector<1x8x8x1xf32>
    %38 = vector.broadcast %37 : vector<1x8x8x1xf32> to vector<1x8x8x4xf32>
    %39 = arith.mulf %38, %11 : vector<1x8x8x4xf32>
    %cst_23 = arith.constant dense<0.000000e+00> : vector<1x8x4xf32>
    %40 = vector.multi_reduction <add>, %39, %cst_23 [2] : vector<1x8x8x4xf32> to vector<1x8x4xf32>
    %41 = arith.addf %36, %40 : vector<1x8x4xf32>
    %c0_24 = arith.constant 0 : index
    %c0_25 = arith.constant 0 : index
    %c0_26 = arith.constant 0 : index
    %42 = vector.load %arg13[%c0_24, %c0_25, %c0_26] : memref<1x8x4xf32, #tpu.memory_space<vmem>>, vector<1x8x4xf32>
    tpu.vector_store %arg13[%c0_24, %c0_25, %c0_26], %41 {strides = array<i32>} : memref<1x8x4xf32, #tpu.memory_space<vmem>>, vector<1x8x4xf32>,
    %c0_27 = arith.constant 0 : index
    %c0_28 = arith.constant 0 : index
    %c0_29 = arith.constant 0 : index
    %43 = vector.load %arg11[%c0_27, %c0_28, %c0_29] : memref<1x8x1xf32, #tpu.memory_space<vmem>>, vector<1x8x1xf32>
    tpu.vector_store %arg11[%c0_27, %c0_28, %c0_29], %21 {strides = array<i32>} : memref<1x8x1xf32, #tpu.memory_space<vmem>>, vector<1x8x1xf32>,
    %c0_i32_30 = arith.constant 0 : i32
    %44 = arith.cmpi eq, %arg1, %c0_i32_30 : i32
    %45 = arith.extui %44 : i1 to i32
    %c0_i32_31 = arith.constant 0 : i32
    %46 = arith.cmpi ne, %45, %c0_i32_31 : i32
    scf.if %46 {
      %c0_32 = arith.constant 0 : index
      %c0_33 = arith.constant 0 : index
      %c0_34 = arith.constant 0 : index
      %47 = vector.load %arg12[%c0_32, %c0_33, %c0_34] : memref<1x8x1xf32, #tpu.memory_space<vmem>>, vector<1x8x1xf32>
      %48 = tpu.reciprocal %47 {approx = true} : vector<1x8x1xf32> -> vector<1x8x1xf32>
      %49 = arith.mulf %47, %48 : vector<1x8x1xf32>
      %cst_35 = arith.constant 2.000000e+00 : f32
      %50 = vector.broadcast %cst_35 : f32 to vector<1x8x1xf32>
      %51 = arith.subf %50, %49 : vector<1x8x1xf32>
      %52 = arith.mulf %48, %51 : vector<1x8x1xf32>
      %c0_36 = arith.constant 0 : index
      %c0_37 = arith.constant 0 : index
      %c0_38 = arith.constant 0 : index
      %53 = vector.load %arg13[%c0_36, %c0_37, %c0_38] : memref<1x8x4xf32, #tpu.memory_space<vmem>>, vector<1x8x4xf32>
      %54 = vector.broadcast %52 : vector<1x8x1xf32> to vector<1x8x4xf32>
      %55 = arith.mulf %53, %54 : vector<1x8x4xf32>
      %c0_39 = arith.constant 0 : index
      %c0_40 = arith.constant 0 : index
      %c0_41 = arith.constant 0 : index
      %56 = vector.load %arg5[%c0_39, %c0_40, %c0_41] : memref<1x8x1xf32, #tpu.memory_space<vmem>>, vector<1x8x1xf32>
      %57 = vector.broadcast %56 : vector<1x8x1xf32> to vector<1x8x4xf32>
      %58 = arith.mulf %55, %57 : vector<1x8x4xf32>
      %59 = vector.shape_cast %58 : vector<1x8x4xf32> to vector<8x4xf32>
      %c0_42 = arith.constant 0 : index
      %c0_43 = arith.constant 0 : index
      %60 = vector.load %arg2[%c0_42, %c0_43] : memref<8x32xf32, #tpu.memory_space<vmem>>, vector<8x32xf32>
      %61 = arith.truncf %60 : vector<8x32xf32> to vector<8x32xbf16>
      %c0_44 = arith.constant 0 : index
      %c0_45 = arith.constant 0 : index
      %62 = vector.load %arg6[%c0_44, %c0_45] : memref<32x16xbf16, #tpu.memory_space<vmem>>, vector<32x16xbf16>
      %cst_46 = arith.constant dense<0.000000e+00> : vector<8x16xf32>
      %63 = tpu.matmul %61, %62, %cst_46 {dimension_numbers = #tpu.dot_dimension_numbers<[1], [0], [0], [1], [0, 0, 1, 1], [], []>} : vector<8x32xbf16>, vector<32x16xbf16>, vector<8x16xf32> -> vector<8x16xf32>
      %c0_47 = arith.constant 0 : index
      %c0_48 = arith.constant 0 : index
      %64 = vector.load %arg7[%c0_47, %c0_48] : memref<1x16xf32, #tpu.memory_space<vmem>>, vector<1x16xf32>
      %65 = vector.broadcast %64 : vector<1x16xf32> to vector<8x16xf32>
      %66 = arith.addf %63, %65 : vector<8x16xf32>
      %67 = arith.truncf %66 : vector<8x16xf32> to vector<8x16xbf16>
      %cst_49 = arith.constant 0.000000e+00 : f32
      %68 = vector.broadcast %cst_49 : f32 to vector<8x32xf32>
      %c0_50 = arith.constant 0 : index
      %c0_51 = arith.constant 0 : index
      %69 = vector.load %arg8[%c0_50, %c0_51] : memref<64x32xbf16, #tpu.memory_space<vmem>>, vector<16x32xbf16>
      %cst_52 = arith.constant dense<0.000000e+00> : vector<8x32xf32>
      %70 = tpu.matmul %67, %69, %cst_52 {dimension_numbers = #tpu.dot_dimension_numbers<[1], [0], [0], [1], [0, 0, 1, 1], [], []>} : vector<8x16xbf16>, vector<16x32xbf16>, vector<8x32xf32> -> vector<8x32xf32>
      %71 = vector.extract_strided_slice %59 {offsets = [0, 0], sizes = [8, 1], strides = [1, 1]} : vector<8x4xf32> to vector<8x1xf32>
      %72 = vector.broadcast %71 : vector<8x1xf32> to vector<8x32xf32>
      %73 = arith.mulf %72, %70 : vector<8x32xf32>
      %74 = arith.addf %68, %73 : vector<8x32xf32>
      %c16 = arith.constant 16 : index
      %c0_53 = arith.constant 0 : index
      %75 = vector.load %arg8[%c16, %c0_53] : memref<64x32xbf16, #tpu.memory_space<vmem>>, vector<16x32xbf16>
      %cst_54 = arith.constant dense<0.000000e+00> : vector<8x32xf32>
      %76 = tpu.matmul %67, %75, %cst_54 {dimension_numbers = #tpu.dot_dimension_numbers<[1], [0], [0], [1], [0, 0, 1, 1], [], []>} : vector<8x16xbf16>, vector<16x32xbf16>, vector<8x32xf32> -> vector<8x32xf32>
      %77 = vector.extract_strided_slice %59 {offsets = [0, 1], sizes = [8, 1], strides = [1, 1]} : vector<8x4xf32> to vector<8x1xf32>
      %78 = vector.broadcast %77 : vector<8x1xf32> to vector<8x32xf32>
      %79 = arith.mulf %78, %76 : vector<8x32xf32>
      %80 = arith.addf %74, %79 : vector<8x32xf32>
      %c32 = arith.constant 32 : index
      %c0_55 = arith.constant 0 : index
      %81 = vector.load %arg8[%c32, %c0_55] : memref<64x32xbf16, #tpu.memory_space<vmem>>, vector<16x32xbf16>
      %cst_56 = arith.constant dense<0.000000e+00> : vector<8x32xf32>
      %82 = tpu.matmul %67, %81, %cst_56 {dimension_numbers = #tpu.dot_dimension_numbers<[1], [0], [0], [1], [0, 0, 1, 1], [], []>} : vector<8x16xbf16>, vector<16x32xbf16>, vector<8x32xf32> -> vector<8x32xf32>
      %83 = vector.extract_strided_slice %59 {offsets = [0, 2], sizes = [8, 1], strides = [1, 1]} : vector<8x4xf32> to vector<8x1xf32>
      %84 = vector.broadcast %83 : vector<8x1xf32> to vector<8x32xf32>
      %85 = arith.mulf %84, %82 : vector<8x32xf32>
      %86 = arith.addf %80, %85 : vector<8x32xf32>
      %c48 = arith.constant 48 : index
      %c0_57 = arith.constant 0 : index
      %87 = vector.load %arg8[%c48, %c0_57] : memref<64x32xbf16, #tpu.memory_space<vmem>>, vector<16x32xbf16>
      %cst_58 = arith.constant dense<0.000000e+00> : vector<8x32xf32>
      %88 = tpu.matmul %67, %87, %cst_58 {dimension_numbers = #tpu.dot_dimension_numbers<[1], [0], [0], [1], [0, 0, 1, 1], [], []>} : vector<8x16xbf16>, vector<16x32xbf16>, vector<8x32xf32> -> vector<8x32xf32>
      %89 = vector.extract_strided_slice %59 {offsets = [0, 3], sizes = [8, 1], strides = [1, 1]} : vector<8x4xf32> to vector<8x1xf32>
      %90 = vector.broadcast %89 : vector<8x1xf32> to vector<8x32xf32>
      %91 = arith.mulf %90, %88 : vector<8x32xf32>
      %92 = arith.addf %86, %91 : vector<8x32xf32>
      %c0_59 = arith.constant 0 : index
      %c0_60 = arith.constant 0 : index
      %93 = vector.load %arg9[%c0_59, %c0_60] : memref<1x32xf32, #tpu.memory_space<vmem>>, vector<1x32xf32>
      %94 = vector.broadcast %93 : vector<1x32xf32> to vector<8x32xf32>
      %95 = arith.addf %92, %94 : vector<8x32xf32>
      %cst_61 = arith.constant 5.000000e-01 : f32
      %96 = vector.broadcast %cst_61 : f32 to vector<8x32xf32>
      %97 = arith.mulf %96, %95 : vector<8x32xf32>
      %cst_62 = arith.constant 0.707106769 : f32
      %98 = vector.broadcast %cst_62 : f32 to vector<8x32xf32>
      %99 = arith.mulf %95, %98 : vector<8x32xf32>
      %100 = math.erf %99 : vector<8x32xf32>
      %cst_63 = arith.constant 1.000000e+00 : f32
      %101 = vector.broadcast %cst_63 : f32 to vector<8x32xf32>
      %102 = arith.addf %101, %100 : vector<8x32xf32>
      %103 = arith.mulf %97, %102 : vector<8x32xf32>
      %c0_64 = arith.constant 0 : index
      %c0_65 = arith.constant 0 : index
      %104 = vector.load %arg10[%c0_64, %c0_65] : memref<8x32xf32, #tpu.memory_space<vmem>>, vector<8x32xf32>
      tpu.vector_store %arg10[%c0_64, %c0_65], %103 {strides = array<i32>} : memref<8x32xf32, #tpu.memory_space<vmem>>, vector<8x32xf32>,
    } else {
    }
    return
  }
  func.func @transform_0(%arg0: i32, %arg1: i32) -> (i32, i32) {
    %c0_i32 = arith.constant 0 : i32
    %c0_i32_0 = arith.constant 0 : i32
    return %arg0, %c0_i32 : i32, i32
  }
  func.func @transform_1(%arg0: i32, %arg1: i32) -> (i32, i32, i32) {
    %c0_i32 = arith.constant 0 : i32
    %c0_i32_0 = arith.constant 0 : i32
    return %arg0, %c0_i32, %arg1 : i32, i32, i32
  }
  func.func @transform_2(%arg0: i32, %arg1: i32) -> (i32, i32, i32, i32) {
    %c0_i32 = arith.constant 0 : i32
    %c0_i32_0 = arith.constant 0 : i32
    %c0_i32_1 = arith.constant 0 : i32
    return %arg0, %c0_i32, %arg1, %c0_i32_0 : i32, i32, i32, i32
  }
  func.func @transform_3(%arg0: i32, %arg1: i32) -> (i32, i32, i32) {
    %c0_i32 = arith.constant 0 : i32
    %c0_i32_0 = arith.constant 0 : i32
    %c0_i32_1 = arith.constant 0 : i32
    return %arg0, %c0_i32, %c0_i32_0 : i32, i32, i32
  }
  func.func @transform_4(%arg0: i32, %arg1: i32) -> (i32, i32) {
    %c0_i32 = arith.constant 0 : i32
    %c0_i32_0 = arith.constant 0 : i32
    %c0_i32_1 = arith.constant 0 : i32
    return %c0_i32, %c0_i32_0 : i32, i32
  }
  func.func @transform_5(%arg0: i32, %arg1: i32) -> (i32, i32) {
    %c0_i32 = arith.constant 0 : i32
    %c0_i32_0 = arith.constant 0 : i32
    %c0_i32_1 = arith.constant 0 : i32
    return %c0_i32, %c0_i32_0 : i32, i32
  }
  func.func @transform_6(%arg0: i32, %arg1: i32) -> (i32, i32) {
    %c0_i32 = arith.constant 0 : i32
    %c0_i32_0 = arith.constant 0 : i32
    %c0_i32_1 = arith.constant 0 : i32
    return %c0_i32, %c0_i32_0 : i32, i32
  }
  func.func @transform_7(%arg0: i32, %arg1: i32) -> (i32, i32) {
    %c0_i32 = arith.constant 0 : i32
    %c0_i32_0 = arith.constant 0 : i32
    %c0_i32_1 = arith.constant 0 : i32
    return %c0_i32, %c0_i32_0 : i32, i32
  }
  func.func @transform_8(%arg0: i32, %arg1: i32) -> (i32, i32) {
    %c0_i32 = arith.constant 0 : i32
    %c0_i32_0 = arith.constant 0 : i32
    return %arg0, %c0_i32 : i32, i32
  }
}

module attributes {stable_mosaic.version = 11 : i64} {
  func.func @_structural_attention_kernel(%arg0: i32, %arg1: i32, %arg2: memref<8x32xf32, #tpu.memory_space<vmem>>, %arg3: memref<1x8x8xbf16, #tpu.memory_space<vmem>>, %arg4: memref<1x8x8x4xbf16, #tpu.memory_space<vmem>>, %arg5: memref<1x8x1xf32, #tpu.memory_space<vmem>>, %arg6: memref<32x16xbf16, #tpu.memory_space<vmem>>, %arg7: memref<1x16xf32, #tpu.memory_space<vmem>>, %arg8: memref<64x32xbf16, #tpu.memory_space<vmem>>, %arg9: memref<1x32xf32, #tpu.memory_space<vmem>>, %arg10: memref<8x32xf32, #tpu.memory_space<vmem>>, %arg11: memref<1x8x1xf32, #tpu.memory_space<vmem>>, %arg12: memref<1x8x1xf32, #tpu.memory_space<vmem>>, %arg13: memref<1x8x4xf32, #tpu.memory_space<vmem>>) attributes {dimension_semantics = [#tpu.dimension_semantics<parallel>, #tpu.dimension_semantics<arbitrary>], iteration_bounds = array<i64: 2, 1>, scalar_prefetch = 0 : i64, scratch_operands = 3 : i64, tpu.core_type = #tpu.core_type<tc>, window_params = [{transform_indices = @transform_0, window_bounds = array<i64: 8, 32>}, {transform_indices = @transform_1, window_bounds = array<i64: 1, 8, 8>}, {transform_indices = @transform_2, window_bounds = array<i64: 1, 8, 8, 4>}, {transform_indices = @transform_3, window_bounds = array<i64: 1, 8, 1>}, {pipeline_mode = #tpu.pipeline_mode<synchronous>, transform_indices = @transform_4, window_bounds = array<i64: 32, 16>}, {pipeline_mode = #tpu.pipeline_mode<synchronous>, transform_indices = @transform_5, window_bounds = array<i64: 1, 16>}, {pipeline_mode = #tpu.pipeline_mode<synchronous>, transform_indices = @transform_6, window_bounds = array<i64: 64, 32>}, {pipeline_mode = #tpu.pipeline_mode<synchronous>, transform_indices = @transform_7, window_bounds = array<i64: 1, 32>}, {transform_indices = @transform_8, window_bounds = array<i64: 8, 32>}]} {
    %c0_i32 = arith.constant 0 : i32
    %0 = arith.cmpi eq, %arg1, %c0_i32 : i32
    %1 = arith.extui %0 : i1 to i32
    %c0_i32_0 = arith.constant 0 : i32
    %2 = arith.cmpi ne, %1, %c0_i32_0 : i32
    scf.if %2 {
      %cst_32 = arith.constant 0xFF800000 : f32
      %47 = vector.broadcast %cst_32 : f32 to vector<1x8x1xf32>
      %c0_33 = arith.constant 0 : index
      %c0_34 = arith.constant 0 : index
      %c0_35 = arith.constant 0 : index
      %48 = vector.load %arg11[%c0_33, %c0_34, %c0_35] : memref<1x8x1xf32, #tpu.memory_space<vmem>>, vector<1x8x1xf32>
      tpu.vector_store %arg11[%c0_33, %c0_34, %c0_35], %47 {strides = array<i32>} : memref<1x8x1xf32, #tpu.memory_space<vmem>>, vector<1x8x1xf32>,
      %cst_36 = arith.constant 0.000000e+00 : f32
      %49 = vector.broadcast %cst_36 : f32 to vector<1x8x1xf32>
      %c0_37 = arith.constant 0 : index
      %c0_38 = arith.constant 0 : index
      %c0_39 = arith.constant 0 : index
      %50 = vector.load %arg12[%c0_37, %c0_38, %c0_39] : memref<1x8x1xf32, #tpu.memory_space<vmem>>, vector<1x8x1xf32>
      tpu.vector_store %arg12[%c0_37, %c0_38, %c0_39], %49 {strides = array<i32>} : memref<1x8x1xf32, #tpu.memory_space<vmem>>, vector<1x8x1xf32>,
      %cst_40 = arith.constant 0.000000e+00 : f32
      %51 = vector.broadcast %cst_40 : f32 to vector<1x8x4xf32>
      %c0_41 = arith.constant 0 : index
      %c0_42 = arith.constant 0 : index
      %c0_43 = arith.constant 0 : index
      %52 = vector.load %arg13[%c0_41, %c0_42, %c0_43] : memref<1x8x4xf32, #tpu.memory_space<vmem>>, vector<1x8x4xf32>
      tpu.vector_store %arg13[%c0_41, %c0_42, %c0_43], %51 {strides = array<i32>} : memref<1x8x4xf32, #tpu.memory_space<vmem>>, vector<1x8x4xf32>,
    } else {
    }
    %c0 = arith.constant 0 : index
    %c0_1 = arith.constant 0 : index
    %c0_2 = arith.constant 0 : index
    %3 = vector.load %arg3[%c0, %c0_1, %c0_2] : memref<1x8x8xbf16, #tpu.memory_space<vmem>>, vector<1x8x8xbf16>
    %4 = arith.extf %3 : vector<1x8x8xbf16> to vector<1x8x8xf32>
    %c0_3 = arith.constant 0 : index
    %c0_4 = arith.constant 0 : index
    %c0_5 = arith.constant 0 : index
    %c0_6 = arith.constant 0 : index
    %5 = vector.load %arg4[%c0_3, %c0_4, %c0_5, %c0_6] : memref<1x8x8x4xbf16, #tpu.memory_space<vmem>>, vector<1x8x8x4xbf16>
    %6 = arith.extf %5 : vector<1x8x8x4xbf16> to vector<1x8x8x4xf32>
    %cst = arith.constant dense<0xFF800000> : vector<1x8x8xf32>
    %7 = vector.multi_reduction <maximumf>, %6, %cst [3] : vector<1x8x8x4xf32> to vector<1x8x8xf32>
    %8 = vector.shape_cast %7 : vector<1x8x8xf32> to vector<1x8x8x1xf32>
    %9 = vector.broadcast %8 : vector<1x8x8x1xf32> to vector<1x8x8x4xf32>
    %10 = arith.subf %6, %9 : vector<1x8x8x4xf32>
    %11 = math.exp %10 : vector<1x8x8x4xf32>
    %cst_7 = arith.constant dense<0.000000e+00> : vector<1x8x8xf32>
    %12 = vector.multi_reduction <add>, %11, %cst_7 [3] : vector<1x8x8x4xf32> to vector<1x8x8xf32>
    %13 = tpu.reciprocal %12 {approx = true} : vector<1x8x8xf32> -> vector<1x8x8xf32>
    %14 = arith.mulf %12, %13 : vector<1x8x8xf32>
    %cst_8 = arith.constant 2.000000e+00 : f32
    %15 = vector.broadcast %cst_8 : f32 to vector<1x8x8xf32>
    %16 = arith.subf %15, %14 : vector<1x8x8xf32>
    %17 = arith.mulf %13, %16 : vector<1x8x8xf32>
    %c0_9 = arith.constant 0 : index
    %c0_10 = arith.constant 0 : index
    %c0_11 = arith.constant 0 : index
    %18 = vector.load %arg11[%c0_9, %c0_10, %c0_11] : memref<1x8x1xf32, #tpu.memory_space<vmem>>, vector<1x8x1xf32>
    %cst_12 = arith.constant dense<0xFF800000> : vector<1x8xf32>
    %19 = vector.multi_reduction <maximumf>, %4, %cst_12 [2] : vector<1x8x8xf32> to vector<1x8xf32>
    %20 = vector.shape_cast %19 : vector<1x8xf32> to vector<1x8x1xf32>
    %21 = arith.maximumf %18, %20 : vector<1x8x1xf32>
    %22 = arith.subf %18, %21 : vector<1x8x1xf32>
    %23 = math.exp %22 : vector<1x8x1xf32>
    %24 = vector.broadcast %21 : vector<1x8x1xf32> to vector<1x8x8xf32>
    %25 = arith.subf %4, %24 : vector<1x8x8xf32>
    %26 = math.exp %25 : vector<1x8x8xf32>
    %c0_13 = arith.constant 0 : index
    %c0_14 = arith.constant 0 : index
    %c0_15 = arith.constant 0 : index
    %27 = vector.load %arg12[%c0_13, %c0_14, %c0_15] : memref<1x8x1xf32, #tpu.memory_space<vmem>>, vector<1x8x1xf32>
    %28 = arith.mulf %23, %27 : vector<1x8x1xf32>
    %cst_16 = arith.constant dense<0.000000e+00> : vector<1x8xf32>
    %29 = vector.multi_reduction <add>, %26, %cst_16 [2] : vector<1x8x8xf32> to vector<1x8xf32>
    %30 = vector.shape_cast %29 : vector<1x8xf32> to vector<1x8x1xf32>
    %31 = arith.addf %28, %30 : vector<1x8x1xf32>
    %c0_17 = arith.constant 0 : index
    %c0_18 = arith.constant 0 : index
    %c0_19 = arith.constant 0 : index
    %32 = vector.load %arg12[%c0_17, %c0_18, %c0_19] : memref<1x8x1xf32, #tpu.memory_space<vmem>>, vector<1x8x1xf32>
    tpu.vector_store %arg12[%c0_17, %c0_18, %c0_19], %31 {strides = array<i32>} : memref<1x8x1xf32, #tpu.memory_space<vmem>>, vector<1x8x1xf32>,
    %33 = arith.mulf %26, %17 : vector<1x8x8xf32>
    %c0_20 = arith.constant 0 : index
    %c0_21 = arith.constant 0 : index
    %c0_22 = arith.constant 0 : index
    %34 = vector.load %arg13[%c0_20, %c0_21, %c0_22] : memref<1x8x4xf32, #tpu.memory_space<vmem>>, vector<1x8x4xf32>
    %35 = vector.broadcast %23 : vector<1x8x1xf32> to vector<1x8x4xf32>
    %36 = arith.mulf %35, %34 : vector<1x8x4xf32>
    %37 = vector.shape_cast %33 : vector<1x8x8xf32> to vector<1x8x8x1xf32>
    %38 = vector.broadcast %37 : vector<1x8x8x1xf32> to vector<1x8x8x4xf32>
    %39 = arith.mulf %38, %11 : vector<1x8x8x4xf32>
    %cst_23 = arith.constant dense<0.000000e+00> : vector<1x8x4xf32>
    %40 = vector.multi_reduction <add>, %39, %cst_23 [2] : vector<1x8x8x4xf32> to vector<1x8x4xf32>
    %41 = arith.addf %36, %40 : vector<1x8x4xf32>
    %c0_24 = arith.constant 0 : index
    %c0_25 = arith.constant 0 : index
    %c0_26 = arith.constant 0 : index
    %42 = vector.load %arg13[%c0_24, %c0_25, %c0_26] : memref<1x8x4xf32, #tpu.memory_space<vmem>>, vector<1x8x4xf32>
    tpu.vector_store %arg13[%c0_24, %c0_25, %c0_26], %41 {strides = array<i32>} : memref<1x8x4xf32, #tpu.memory_space<vmem>>, vector<1x8x4xf32>,
    %c0_27 = arith.constant 0 : index
    %c0_28 = arith.constant 0 : index
    %c0_29 = arith.constant 0 : index
    %43 = vector.load %arg11[%c0_27, %c0_28, %c0_29] : memref<1x8x1xf32, #tpu.memory_space<vmem>>, vector<1x8x1xf32>
    tpu.vector_store %arg11[%c0_27, %c0_28, %c0_29], %21 {strides = array<i32>} : memref<1x8x1xf32, #tpu.memory_space<vmem>>, vector<1x8x1xf32>,
    %c0_i32_30 = arith.constant 0 : i32
    %44 = arith.cmpi eq, %arg1, %c0_i32_30 : i32
    %45 = arith.extui %44 : i1 to i32
    %c0_i32_31 = arith.constant 0 : i32
    %46 = arith.cmpi ne, %45, %c0_i32_31 : i32
    scf.if %46 {
      %c0_32 = arith.constant 0 : index
      %c0_33 = arith.constant 0 : index
      %c0_34 = arith.constant 0 : index
      %47 = vector.load %arg12[%c0_32, %c0_33, %c0_34] : memref<1x8x1xf32, #tpu.memory_space<vmem>>, vector<1x8x1xf32>
      %48 = tpu.reciprocal %47 {approx = true} : vector<1x8x1xf32> -> vector<1x8x1xf32>
      %49 = arith.mulf %47, %48 : vector<1x8x1xf32>
      %cst_35 = arith.constant 2.000000e+00 : f32
      %50 = vector.broadcast %cst_35 : f32 to vector<1x8x1xf32>
      %51 = arith.subf %50, %49 : vector<1x8x1xf32>
      %52 = arith.mulf %48, %51 : vector<1x8x1xf32>
      %c0_36 = arith.constant 0 : index
      %c0_37 = arith.constant 0 : index
      %c0_38 = arith.constant 0 : index
      %53 = vector.load %arg13[%c0_36, %c0_37, %c0_38] : memref<1x8x4xf32, #tpu.memory_space<vmem>>, vector<1x8x4xf32>
      %54 = vector.broadcast %52 : vector<1x8x1xf32> to vector<1x8x4xf32>
      %55 = arith.mulf %53, %54 : vector<1x8x4xf32>
      %c0_39 = arith.constant 0 : index
      %c0_40 = arith.constant 0 : index
      %c0_41 = arith.constant 0 : index
      %56 = vector.load %arg5[%c0_39, %c0_40, %c0_41] : memref<1x8x1xf32, #tpu.memory_space<vmem>>, vector<1x8x1xf32>
      %57 = vector.broadcast %56 : vector<1x8x1xf32> to vector<1x8x4xf32>
      %58 = arith.mulf %55, %57 : vector<1x8x4xf32>
      %59 = vector.shape_cast %58 : vector<1x8x4xf32> to vector<8x4xf32>
      %c0_42 = arith.constant 0 : index
      %c0_43 = arith.constant 0 : index
      %60 = vector.load %arg2[%c0_42, %c0_43] : memref<8x32xf32, #tpu.memory_space<vmem>>, vector<8x32xf32>
      %61 = arith.truncf %60 : vector<8x32xf32> to vector<8x32xbf16>
      %c0_44 = arith.constant 0 : index
      %c0_45 = arith.constant 0 : index
      %62 = vector.load %arg6[%c0_44, %c0_45] : memref<32x16xbf16, #tpu.memory_space<vmem>>, vector<32x16xbf16>
      %cst_46 = arith.constant dense<0.000000e+00> : vector<8x16xf32>
      %63 = tpu.matmul %61, %62, %cst_46 {dimension_numbers = #tpu.dot_dimension_numbers<[1], [0], [0], [1], [0, 0, 1, 1], [], []>} : vector<8x32xbf16>, vector<32x16xbf16>, vector<8x16xf32> -> vector<8x16xf32>
      %c0_47 = arith.constant 0 : index
      %c0_48 = arith.constant 0 : index
      %64 = vector.load %arg7[%c0_47, %c0_48] : memref<1x16xf32, #tpu.memory_space<vmem>>, vector<1x16xf32>
      %65 = vector.broadcast %64 : vector<1x16xf32> to vector<8x16xf32>
      %66 = arith.addf %63, %65 : vector<8x16xf32>
      %67 = arith.truncf %66 : vector<8x16xf32> to vector<8x16xbf16>
      %cst_49 = arith.constant 0.000000e+00 : f32
      %68 = vector.broadcast %cst_49 : f32 to vector<8x32xf32>
      %c0_50 = arith.constant 0 : index
      %c0_51 = arith.constant 0 : index
      %69 = vector.load %arg8[%c0_50, %c0_51] : memref<64x32xbf16, #tpu.memory_space<vmem>>, vector<16x32xbf16>
      %cst_52 = arith.constant dense<0.000000e+00> : vector<8x32xf32>
      %70 = tpu.matmul %67, %69, %cst_52 {dimension_numbers = #tpu.dot_dimension_numbers<[1], [0], [0], [1], [0, 0, 1, 1], [], []>} : vector<8x16xbf16>, vector<16x32xbf16>, vector<8x32xf32> -> vector<8x32xf32>
      %71 = vector.extract_strided_slice %59 {offsets = [0, 0], sizes = [8, 1], strides = [1, 1]} : vector<8x4xf32> to vector<8x1xf32>
      %72 = vector.broadcast %71 : vector<8x1xf32> to vector<8x32xf32>
      %73 = arith.mulf %72, %70 : vector<8x32xf32>
      %74 = arith.addf %68, %73 : vector<8x32xf32>
      %c16 = arith.constant 16 : index
      %c0_53 = arith.constant 0 : index
      %75 = vector.load %arg8[%c16, %c0_53] : memref<64x32xbf16, #tpu.memory_space<vmem>>, vector<16x32xbf16>
      %cst_54 = arith.constant dense<0.000000e+00> : vector<8x32xf32>
      %76 = tpu.matmul %67, %75, %cst_54 {dimension_numbers = #tpu.dot_dimension_numbers<[1], [0], [0], [1], [0, 0, 1, 1], [], []>} : vector<8x16xbf16>, vector<16x32xbf16>, vector<8x32xf32> -> vector<8x32xf32>
      %77 = vector.extract_strided_slice %59 {offsets = [0, 1], sizes = [8, 1], strides = [1, 1]} : vector<8x4xf32> to vector<8x1xf32>
      %78 = vector.broadcast %77 : vector<8x1xf32> to vector<8x32xf32>
      %79 = arith.mulf %78, %76 : vector<8x32xf32>
      %80 = arith.addf %74, %79 : vector<8x32xf32>
      %c32 = arith.constant 32 : index
      %c0_55 = arith.constant 0 : index
      %81 = vector.load %arg8[%c32, %c0_55] : memref<64x32xbf16, #tpu.memory_space<vmem>>, vector<16x32xbf16>
      %cst_56 = arith.constant dense<0.000000e+00> : vector<8x32xf32>
      %82 = tpu.matmul %67, %81, %cst_56 {dimension_numbers = #tpu.dot_dimension_numbers<[1], [0], [0], [1], [0, 0, 1, 1], [], []>} : vector<8x16xbf16>, vector<16x32xbf16>, vector<8x32xf32> -> vector<8x32xf32>
      %83 = vector.extract_strided_slice %59 {offsets = [0, 2], sizes = [8, 1], strides = [1, 1]} : vector<8x4xf32> to vector<8x1xf32>
      %84 = vector.broadcast %83 : vector<8x1xf32> to vector<8x32xf32>
      %85 = arith.mulf %84, %82 : vector<8x32xf32>
      %86 = arith.addf %80, %85 : vector<8x32xf32>
      %c48 = arith.constant 48 : index
      %c0_57 = arith.constant 0 : index
      %87 = vector.load %arg8[%c48, %c0_57] : memref<64x32xbf16, #tpu.memory_space<vmem>>, vector<16x32xbf16>
      %cst_58 = arith.constant dense<0.000000e+00> : vector<8x32xf32>
      %88 = tpu.matmul %67, %87, %cst_58 {dimension_numbers = #tpu.dot_dimension_numbers<[1], [0], [0], [1], [0, 0, 1, 1], [], []>} : vector<8x16xbf16>, vector<16x32xbf16>, vector<8x32xf32> -> vector<8x32xf32>
      %89 = vector.extract_strided_slice %59 {offsets = [0, 3], sizes = [8, 1], strides = [1, 1]} : vector<8x4xf32> to vector<8x1xf32>
      %90 = vector.broadcast %89 : vector<8x1xf32> to vector<8x32xf32>
      %91 = arith.mulf %90, %88 : vector<8x32xf32>
      %92 = arith.addf %86, %91 : vector<8x32xf32>
      %c0_59 = arith.constant 0 : index
      %c0_60 = arith.constant 0 : index
      %93 = vector.load %arg9[%c0_59, %c0_60] : memref<1x32xf32, #tpu.memory_space<vmem>>, vector<1x32xf32>
      %94 = vector.broadcast %93 : vector<1x32xf32> to vector<8x32xf32>
      %95 = arith.addf %92, %94 : vector<8x32xf32>
      %cst_61 = arith.constant 5.000000e-01 : f32
      %96 = vector.broadcast %cst_61 : f32 to vector<8x32xf32>
      %97 = arith.mulf %96, %95 : vector<8x32xf32>
      %cst_62 = arith.constant 0.707106769 : f32
      %98 = vector.broadcast %cst_62 : f32 to vector<8x32xf32>
      %99 = arith.mulf %95, %98 : vector<8x32xf32>
      %100 = math.erf %99 : vector<8x32xf32>
      %cst_63 = arith.constant 1.000000e+00 : f32
      %101 = vector.broadcast %cst_63 : f32 to vector<8x32xf32>
      %102 = arith.addf %101, %100 : vector<8x32xf32>
      %103 = arith.mulf %97, %102 : vector<8x32xf32>
      %c0_64 = arith.constant 0 : index
      %c0_65 = arith.constant 0 : index
      %104 = vector.load %arg10[%c0_64, %c0_65] : memref<8x32xf32, #tpu.memory_space<vmem>>, vector<8x32xf32>
      tpu.vector_store %arg10[%c0_64, %c0_65], %103 {strides = array<i32>} : memref<8x32xf32, #tpu.memory_space<vmem>>, vector<8x32xf32>,
    } else {
    }
    return
  }
  func.func @transform_0(%arg0: i32, %arg1: i32) -> (i32, i32) {
    %c0_i32 = arith.constant 0 : i32
    %c0_i32_0 = arith.constant 0 : i32
    return %arg0, %c0_i32 : i32, i32
  }
  func.func @transform_1(%arg0: i32, %arg1: i32) -> (i32, i32, i32) {
    %c0_i32 = arith.constant 0 : i32
    %c0_i32_0 = arith.constant 0 : i32
    return %arg0, %c0_i32, %arg1 : i32, i32, i32
  }
  func.func @transform_2(%arg0: i32, %arg1: i32) -> (i32, i32, i32, i32) {
    %c0_i32 = arith.constant 0 : i32
    %c0_i32_0 = arith.constant 0 : i32
    %c0_i32_1 = arith.constant 0 : i32
    return %arg0, %c0_i32, %arg1, %c0_i32_0 : i32, i32, i32, i32
  }
  func.func @transform_3(%arg0: i32, %arg1: i32) -> (i32, i32, i32) {
    %c0_i32 = arith.constant 0 : i32
    %c0_i32_0 = arith.constant 0 : i32
    %c0_i32_1 = arith.constant 0 : i32
    return %arg0, %c0_i32, %c0_i32_0 : i32, i32, i32
  }
  func.func @transform_4(%arg0: i32, %arg1: i32) -> (i32, i32) {
    %c0_i32 = arith.constant 0 : i32
    %c0_i32_0 = arith.constant 0 : i32
    %c0_i32_1 = arith.constant 0 : i32
    return %c0_i32, %c0_i32_0 : i32, i32
  }
  func.func @transform_5(%arg0: i32, %arg1: i32) -> (i32, i32) {
    %c0_i32 = arith.constant 0 : i32
    %c0_i32_0 = arith.constant 0 : i32
    %c0_i32_1 = arith.constant 0 : i32
    return %c0_i32, %c0_i32_0 : i32, i32
  }
  func.func @transform_6(%arg0: i32, %arg1: i32) -> (i32, i32) {
    %c0_i32 = arith.constant 0 : i32
    %c0_i32_0 = arith.constant 0 : i32
    %c0_i32_1 = arith.constant 0 : i32
    return %c0_i32, %c0_i32_0 : i32, i32
  }
  func.func @transform_7(%arg0: i32, %arg1: i32) -> (i32, i32) {
    %c0_i32 = arith.constant 0 : i32
    %c0_i32_0 = arith.constant 0 : i32
    %c0_i32_1 = arith.constant 0 : i32
    return %c0_i32, %c0_i32_0 : i32, i32
  }
  func.func @transform_8(%arg0: i32, %arg1: i32) -> (i32, i32) {
    %c0_i32 = arith.constant 0 : i32
    %c0_i32_0 = arith.constant 0 : i32
    return %arg0, %c0_i32 : i32, i32
  }
}

</mosaic_0001>

<bundles_post_ra>
// kernel: tpu_custom_call.1
= control target key start
LH: loop header
LB: loop body
LE: loop exit
PB: predicated region body
PF: predicated region fallthrough
CT: control target
= control target key end

     0   :  { %13 = vsyncpa [#allocation6], 0  ;;  %s1864_s0 = inlined_call_operand.vmem [shape: f32[16,32], index: 0, kind: input, shape index: {}]   ;;  %s1865_s1 = inlined_call_operand.vmem [shape: bf16[2,8,8], index: 1, kind: input, shape index: {}]   ;;  %s1866_s2 = inlined_call_operand.vmem [shape: bf16[2,8,8,4], index: 2, kind: input, shape index: {}]   ;;  %s1867_s3 = inlined_call_operand.vmem [shape: f32[2,8,1], index: 3, kind: input, shape index: {}]   ;;  %s1868_s4 = inlined_call_operand.vmem [shape: bf16[32,16], index: 4, kind: input, shape index: {}]   ;;  %s1869_s5 = inlined_call_operand.vmem [shape: f32[1,16], index: 5, kind: input, shape index: {}]   ;;  %s1870_s6 = inlined_call_operand.vmem [shape: bf16[64,32], index: 6, kind: input, shape index: {}]   ;;  %s1871_s7 = inlined_call_operand.vmem [shape: f32[1,32], index: 7, kind: input, shape index: {}]   ;;  %s1872_s8 = inlined_call_operand.hbm [shape: f32[16,32], index: 8, kind: output, shape index: {}]  }
   0x1   :  { %15 = vsyncpa [#allocation6 + $0x1], 0  ;;  %s1542_s27 = smov 0   ;;  %s1544_s28 = smov 0  }
   0x2   :  { %s1546_s29 = smov 0   ;;  %s1548_s30 = smov 0  }
   0x3   :  { %s1550_s9 = smov 0   ;;  %s1552_s10 = smov 0  }
   0x4 LB: > { %s1204_s11 = sadd.s32 4294967295, %s1487_s10   ;;  %s1205_s12 = sadd.s32 4294967294, %s1487_s10   ;;  %s1487_s10 = sphi %s1552_s10, %s21_s10   ;;  %s1483_s9 = sphi %s1550_s9, %s1879_s9   ;;  %s1479_s30 = sphi %s1548_s30, %s1878_s30   ;;  %s1475_s29 = sphi %s1546_s29, %s1877_s29   ;;  %s1471_s28 = sphi %s1544_s28, %s1876_s28   ;;  %s1467_s27 = sphi %s1542_s27, %s1875_s27  }
   0x5   : > { %s33_s13 = sadd.s32 1, %s1483_s9  ;;  %s232_s14 = sadd.s32 1, %s1475_s29 }
   0x6   : > { %p35_p0 = scmp.ge.s32.totalorder %s33_s13, 2  ;;  %p242_p1 = scmp.ne.s32.totalorder %s1475_s29, %s1471_s28 }
   0x7   : > { %p243_p2 = scmp.eq.s32.totalorder %s1204_s11, 1  ;;  %p248_p3 = scmp.ne.s32.totalorder %s1471_s28, %s1467_s27 }
   0x8   : > { %s1881_s13 = smov (%p35_p0, %s33_s13), 0  ;;  %p249_p5 = scmp.eq.s32.totalorder %s1205_s12, 1 }
   0x9   : > { %p1582_p4 = por %p243_p2, %p242_p1  ;;  %s229_s16 = ssub.s32 %s1483_s9, %s1881_s13 }
   0xa   : > { %p1208_p6 = scmp.ge.s32.totalorder %s1487_s10, 1  ;;  %p230_p7 = scmp.eq.s32.totalorder %s229_s16, 0 }
   0xb   : > { %p1589_p8 = por %p249_p5, %p248_p3  ;;  %p314_p9 = scmp.lt.s32.totalorder %s1487_s10, 3 }
   0xc   : > { %s1595_s18 = scalar_select %p230_p7, %s1475_s29, %s232_s14  }
   0xd   : > { %p315_p10 = pnand %p1208_p6, %p314_p9 }
   0xe   : > { %p366_p11 = scmp.lt.s32.totalorder (!%p315_p10), %s1479_s30, 1  ;;  %vm394_vm0 = vcmask (!%p315_p10), 7168   ;;  %v1489_v0 = vmov (!%p315_p10), -inf   ;;  %vm523_vm1 = vcmask (!%p315_p10), 64512   ;;  %vm397_vm2 = vcmask (!%p315_p10), 31744   ;;  %v1363_v26 = vld [vmem:[%s1868_s4] sm:$0xff] (!%p315_p10)  }
   0xf   : > { %318 = sbr.rel (%p315_p10) target bundleno = 794 (0x31a), region = 52  ;;  %395 = vst.msk [vmem:[#allocation2] sm:$0xff] (!%p315_p10), %vm394_vm0, %v1489_v0  ;;  %v1490_v24 = vmov (!%p315_p10), 0   ;;  %v1491_v25 = vmov (!%p315_p10), 0.0   ;;  %vm1492_vm3 = vmmov (!%p315_p10), 0   ;;  %v1364_v27 = vld [vmem:[%s1868_s4 + $0x8] sm:$0xff] (!%p315_p10)  }
  0x10   : > { %1357 = vset.pattern.permute.xlu1 (!%p315_p10), %v1490_v24  ;;  %1358 = vset.pattern.permute.xlu0 (!%p315_p10), %v1490_v24  ;;  %396 = vst.msk [vmem:[#allocation3] sm:$0xff] (!%p315_p10), %vm394_vm0, %v1491_v25  ;;  %vm798_vm4 = vcmask (!%p315_p10), 261120   ;;  %vm589_vm5 = vcmask (!%p315_p10), 1041409   ;;  %vm591_vm6 = vcmask (!%p315_p10), 1042434   ;;  %vm593_vm7 = vcmask (!%p315_p10), 1043459   ;;  %s363_s12 = sand.u32 (!%p315_p10), 1, %s1471_s28  }
  0x11   : > { %1263 = vmatprep.subr.bf16.mxu0 (!%p315_p10), %v1491_v25  ;;  %398 = vst.msk [vmem:[#allocation4] sm:$0xff] (!%p315_p10), %vm397_vm2, %v1491_v25  ;;  %1271 = vmatprep.subr.bf16.mxu1 (!%p315_p10), %v1491_v25  ;;  %vm595_vm8 = vcmask (!%p315_p10), 1044484   ;;  %vm597_vm9 = vcmask (!%p315_p10), 1045509   ;;  %vm599_vm10 = vcmask (!%p315_p10), 1046534   ;;  %vm601_vm11 = vcmask (!%p315_p10), 1047559   ;;  %s1209_s14 = sshll.u32 (!%p315_p10), %s363_s12, 3 }
  0x12   : > { %1267 = vmatprep.mubr.msk.bf16.mxu0 (!%p315_p10), %vm1492_vm3, %v1491_v25  ;;  %1273 = vmatprep.mubr.msk.bf16.mxu1 (!%p315_p10), %vm1492_vm3, %v1491_v25  ;;  %vm851_vm12 = vcmask (!%p315_p10), 130048  }
  0x13   : > { %1264 = vmatpush3.bf16.msra.mxu0 (!%p315_p10), %v1363_v26 }
  0x14   : > { %1265 = vmatprep.subr.bf16.mxu0 (!%p315_p10), %v1491_v25 }
  0x16   : > { %s1600_s19 = scalar_select %p366_p11, %s1479_s30, 1  ;;  %v1675_v30 = vld [vmem:[#allocation2] sm:$0xff] }
  0x17   : > { %1266 = vmatpush3.bf16.msra.mxu0 %v1364_v27 }
  0x18   : > { %s1211_s20 = sshll.u32 %s1600_s19, 2  ;;  %s1232_s21 = sshll.u32 %s1600_s19, 5  ;;  %1283 = vmatprep.subr.bf16.mxu0 %v1491_v25 }
  0x19   : > { %s376_s24 = scalar_lea.vmem %s1865_s1, %s1211_s20  ;;  %s384_s11 = scalar_lea.vmem %s1866_s2, %s1232_s21 }
  0x1a   : > { %v1610_v1 = vld [vmem:[%s376_s24] sm:$0xf]  ;;  %v1614_v3 = vld [vmem:[%s384_s11 + $0x8] sm:$0xff]   ;;  %v1620_v8 = vld [vmem:[%s384_s11 + $0x10] sm:$0xff]   ;;  %s1210_s16 = sshll.u32 %s1600_s19, 3  ;;  %s1229_s20 = sshll.u32 %s1479_s30, 7 }
  0x1b   : > { %v1612_v2 = vld [vmem:[%s384_s11] sm:$0xff]   ;;  %v400_v4 = vunpack.c.l.bf16 %v1610_v1  ;;  %v1239_v7 = vunpack.c.l.bf16 %v1614_v3  ;;  %v1240_v13 = vunpack.c.h.bf16 %v1614_v3  ;;  %v1243_v14 = vunpack.c.l.bf16 %v1620_v8  ;;  %v1634_v15 = vld [vmem:[%s384_s11 + $0x18] sm:$0xff]   ;;  %s369_s22 = scalar_lea.vmem %s1864_s0, %s1210_s16  ;;  %s388_s23 = scalar_lea.vmem %s1867_s3, %s1210_s16 }
  0x1c   : > { %v1235_v5 = vunpack.c.l.bf16 %v1612_v2  ;;  %v1236_v6 = vunpack.c.h.bf16 %v1612_v2  ;;  %v1244_v18 = vunpack.c.h.bf16 %v1620_v8  ;;  %v1247_v19 = vunpack.c.l.bf16 %v1634_v15  ;;  %v773_v28 = vld [vmem:[%s369_s22] sm:$0xff]  ;;  %s365_s21 = scalar_lea.vmem [#allocation5], %s1209_s14  ;;  %s1816_s24 = scalar_lea.hbm %s1872_s8, %s1229_s20 }
  0x1d   : > { %v524_v9 = vsel %vm523_vm1, %v400_v4, -inf  ;;  %v424_v12 = vsel %vm397_vm2, %v1239_v7, -inf  ;;  %v427_v16 = vsel %vm397_vm2, %v1240_v13, -inf  ;;  %v430_v17 = vsel %vm397_vm2, %v1243_v14, -inf  ;;  %s1092_s22 = sshll.u32 %s365_s21, 4  ;;  %s1079_s16 = scalar_lea.sflag [#allocation6], %s363_s12  ;;  %s1818_s22 = int_to_ptr.vmem [resolvable:$true] %s1092_s22 }
  0x1e   : > { %v421_v10 = vsel %vm397_vm2, %v1236_v6, -inf  ;;  %525 = vmax.xlane.f32.xlu0 %v524_v9  ;;  %v418_v11 = vsel %vm397_vm2, %v1235_v5, -inf  ;;  %v433_v20 = vsel %vm397_vm2, %v1244_v18, -inf  ;;  %v436_v21 = vsel %vm397_vm2, %v1247_v19, -inf  ;;  %s1409_s25 = scalar_lea.vmem %s1818_s22, 128  ;;  %s1496_s30 = smov [#allocation5]  }
  0x1f   : > { %422 = vmax.xlane.f32.xlu1 %v421_v10  ;;  %v1248_v22 = vunpack.c.h.bf16 %v1634_v15  ;;  %v774_v29 = vpack.c.bf16 %v773_v28, %v773_v28  ;;  %p1410_p12 = scmp.ne.s32.totalorder %s1818_s22, %s1409_s25  ;;  %s1413_s26 = sshll.u32 %s1496_s30, 4  ;;  %s1414_s26 = int_to_ptr.vmem [resolvable:$false] %s1413_s26 }
  0x20   : > { %s1415_s11 = scalar_lea.vmem %s1414_s26, 256  ;;  %p1416_p1 = scmp.lt.s32.totalorder %s1818_s22, %s1414_s26 }
  0x21   : > { %v439_v23 = vsel %vm397_vm2, %v1248_v22, -inf  ;;  %1268 = vmatmul.mubr.msk.bf16.vlgmr.msra.gmra.mrb[0].mxu0 %vm798_vm4, %v774_v29  ;;  %p1411_p13 = pnand %p1410_p12, %p1582_p4  ;;  %p1417_p2 = scmp.lt.s32.totalorder %s1415_s11, %s1409_s25 }
  0x22   : > { %419 = vmax.xlane.f32.xlu0 %v418_v11  ;;  %1285 = vmatprep.mubr.msk.bf16.mxu0 %vm1492_vm3, %v1491_v25 }
  0x23   : > { %425 = vmax.xlane.f32.xlu1 %v424_v12  ;;  %p1412_p0 = pneg %p1411_p13  ;;  %p1418_p3 = por %p1417_p2, %p1416_p1 }
  0x25   : > { %p1419_p5 = pnand %p1418_p3, %p1412_p0 }
  0x26   : > { %428 = vmax.xlane.f32.xlu0 %v427_v16 }
  0x27   : > { %431 = vmax.xlane.f32.xlu1 %v430_v17 }
  0x2a   : > { %434 = vmax.xlane.f32.xlu0 %v433_v20 }
  0x2b   : > { %437 = vmax.xlane.f32.xlu1 %v436_v21 }
  0x2e   : > { %440 = vmax.xlane.f32.xlu0 %v439_v23 }
  0xab   : > { %v526_v31 = vpop.xlane.xlu0 %525 }
  0xac   : > { %v423_v32 = vpop.xlane.xlu1 %422  ;;  %v1678_v33 = vmax.f32 %v1675_v30, %v526_v31 }
  0xad   : > { %v443_v34 = vsub.f32 %v1236_v6, %v423_v32 }
  0xae   : > { %v528_v35 = vsub.f32 %v1675_v30, %v1678_v33  ;;  %750 = vst.msk [vmem:[#allocation2] sm:$0xff] %vm394_vm0, %v1678_v33  ;;  %533 = vperm.xlu1 %1357, %v1678_v33  }
  0xaf   : > { %v420_v36 = vpop.xlane.xlu0 %419  ;;  %v452_v37 = vmul.f32 1.442695, %v443_v34 }
  0xb0   : > { %v426_v38 = vpop.xlane.xlu1 %425  ;;  %v442_v39 = vsub.f32 %v1235_v5, %v420_v36 }
  0xb1   : > { %v444_v40 = vsub.f32 %v1239_v7, %v426_v38  ;;  %1369 = vpow2.f32 %v452_v37 }
  0xb2   : > { %v450_v41 = vmul.f32 1.442695, %v442_v39 }
  0xb3   : > { %v429_v42 = vpop.xlane.xlu0 %428  ;;  %v454_v44 = vmul.f32 1.442695, %v444_v40 }
  0xb4   : > { %v432_v43 = vpop.xlane.xlu1 %431  ;;  %1371 = vpow2.f32 %v450_v41  ;;  %v445_v45 = vsub.f32 %v1240_v13, %v429_v42 }
  0xb5   : > { %1373 = vpow2.f32 %v454_v44  ;;  %v446_v50 = vsub.f32 %v1243_v14, %v432_v43 }
  0xb6   : > { %v456_v47 = vmul.f32 1.442695, %v445_v45 }
  0xb7   : > { %v435_v46 = vpop.xlane.xlu0 %434  ;;  %v458_v56 = vmul.f32 1.442695, %v446_v50 }
  0xb8   : > { %v447_v48 = vsub.f32 %v1244_v18, %v435_v46  ;;  %v438_v49 = vpop.xlane.xlu1 %437  ;;  %1375 = vpow2.f32 %v456_v47 }
  0xb9   : > { %v448_v52 = vsub.f32 %v1247_v19, %v438_v49 }
  0xba   : > { %v460_v51 = vmul.f32 1.442695, %v447_v48 }
  0xbb   : > { %v1691_v53 = vpop.eup %1369  ;;  %v441_v54 = vpop.xlane.xlu0 %440  ;;  %v462_v58 = vmul.f32 1.442695, %v448_v52 }
  0xbc   : > { %1377 = vpow2.f32 %v460_v51  ;;  %v449_v59 = vsub.f32 %v1248_v22, %v441_v54  ;;  %v469_v60 = vsel %vm397_vm2, %v1691_v53, 0.0  ;;  %v555_v22 = vlaneseq }
  0xbd   : > { %1379 = vpow2.f32 %v458_v56 }
  0xbe   : > { %v1693_v55 = vpop.eup %1371  ;;  %1381 = vpow2.f32 %v462_v58  ;;  %v464_v62 = vmul.f32 1.442695, %v449_v59  ;;  %v556_v26 = vand.u32 127, %v555_v22  ;;  %v1731_v27 = vshrl.u32 %v555_v22, 7 }
  0xbf   : > { %v466_v57 = vsel %vm397_vm2, %v1693_v55, 0.0  ;;  %v1701_v61 = vpop.eup %1373 }
  0xc0   : > { %467 = vadd.xlane.f32.xlu0 %v466_v57  ;;  %v472_v63 = vsel %vm397_vm2, %v1701_v61, 0.0  ;;  %1383 = vpow2.f32 %v464_v62  ;;  %v559_v37 = vsub.s32 %v556_v26, %v1731_v27 }
  0xc2   : > { %v1705_v0 = vpop.eup %1375 }
  0xc3   : > { %v475_v2 = vsel %vm397_vm2, %v1705_v0, 0.0 }
  0xc4   : > { %470 = vadd.xlane.f32.xlu0 %v469_v60 }
  0xc6   : > { %v1709_v3 = vpop.eup %1377 }
  0xc7   : > { %v1711_v5 = vpop.eup %1379  ;;  %v481_v6 = vsel %vm397_vm2, %v1709_v3, 0.0 }
  0xc8   : > { %473 = vadd.xlane.f32.xlu0 %v472_v63  ;;  %v1715_v7 = vpop.eup %1381  ;;  %v478_v8 = vsel %vm397_vm2, %v1711_v5, 0.0 }
  0xc9   : > { %v484_v9 = vsel %vm397_vm2, %v1715_v7, 0.0 }
  0xca   : > { %v1721_v10 = vpop.eup %1383 }
  0xcb   : > { %v487_v11 = vsel %vm397_vm2, %v1721_v10, 0.0 }
  0xcc   : > { %476 = vadd.xlane.f32.xlu0 %v475_v2 }
  0xd0   : > { %482 = vadd.xlane.f32.xlu0 %v481_v6 }
  0xd2   : > { %479 = vadd.xlane.f32.xlu1 %v478_v8 }
  0xd4   : > { %485 = vadd.xlane.f32.xlu0 %v484_v9 }
  0xd8   : > { %488 = vadd.xlane.f32.xlu0 %v487_v11 }
 0x12d   : > { %v534_v12 = vpop.permute.xlu1 %533 }
 0x12e   : > { %v536_v13 = vsub.f32 %v400_v4, %v534_v12 }
 0x130   : > { %v537_v14 = vmul.f32 1.442695, %v536_v13 }
 0x132   : > { %1385 = vpow2.f32 %v537_v14 }
 0x13c   : > { %v1727_v15 = vpop.eup %1385 }
 0x13d   : > { %v541_v16 = vsel %vm523_vm1, %v1727_v15, 0.0 }
 0x13e   : > { %542 = vadd.xlane.f32.xlu0 %v541_v16 }
 0x14d   : > { %v468_v17 = vpop.xlane.xlu0 %467 }
 0x14e   : > { %1387 = vrcp.f32 %v468_v17 }
 0x151   : > { %v471_v18 = vpop.xlane.xlu0 %470 }
 0x152   : > { %1389 = vrcp.f32 %v471_v18 }
 0x155   : > { %v474_v19 = vpop.xlane.xlu0 %473 }
 0x156   : > { %1391 = vrcp.f32 %v474_v19 }
 0x158   : > { %v1388_v20 = vpop.eup %1387 }
 0x159   : > { %v477_v21 = vpop.xlane.xlu0 %476  ;;  %v498_v23 = vmul.f32 %v1388_v20, %v468_v17 }
 0x15a   : > { %1393 = vrcp.f32 %v477_v21 }
 0x15b   : > { %v506_v28 = vsub.f32 2.0, %v498_v23  ;;  %v529_v23 = vmul.f32 1.442695, %v528_v35 }
 0x15c   : > { %v1390_v1 = vpop.eup %1389 }
 0x15d   : > { %v499_v4 = vmul.f32 %v1390_v1, %v471_v18  ;;  %v483_v24 = vpop.xlane.xlu0 %482  ;;  %v514_v38 = vmul.f32 %v1388_v20, %v506_v28 }
 0x15e   : > { %1395 = vrcp.f32 %v483_v24 }
 0x15f   : > { %v507_v29 = vsub.f32 2.0, %v499_v4  ;;  %v480_v31 = vpop.xlane.xlu1 %479  ;;  %v560_v45 = vrot.slane %v514_v38, %v559_v37  ;;  %v621_v4 = vsub.s32 1, %v1731_v27 }
 0x160   : > { %v1392_v32 = vpop.eup %1391  ;;  %1397 = vrcp.f32 %v480_v31 }
 0x161   : > { %v500_v34 = vmul.f32 %v1392_v32, %v474_v19  ;;  %v486_v36 = vpop.xlane.xlu0 %485  ;;  %v515_v39 = vmul.f32 %v1390_v1, %v507_v29  ;;  %v1215_v29 = vld [vmem:[%s1869_s5] ss:$0 sm:$0xff] }
 0x162   : > { %1399 = vrcp.f32 %v486_v36 }
 0x163   : > { %v508_v40 = vsub.f32 2.0, %v500_v34  ;;  %v564_v46 = vrot.slane %v515_v39, %v559_v37 }
 0x164   : > { %v1394_v41 = vpop.eup %1393 }
 0x165   : > { %v516_v42 = vmul.f32 %v1392_v32, %v508_v40  ;;  %v501_v43 = vmul.f32 %v1394_v41, %v477_v21  ;;  %v489_v44 = vpop.xlane.xlu0 %488  ;;  %v590_v54 = vsel %vm589_vm5, %v564_v46, %v560_v45  ;;  %v1365_v32 = vld [vmem:[%s1870_s6] sm:$0xff]   ;;  %v642_v45 = vsub.s32 4, %v1731_v27 }
 0x166   : > { %1401 = vrcp.f32 %v489_v44  ;;  %1272 = vmatpush3.bf16.msra.mxu1 %v1365_v32 }
 0x167   : > { %v509_v47 = vsub.f32 2.0, %v501_v43  ;;  %v568_v49 = vrot.slane %v516_v42, %v559_v37  ;;  %1403 = vpow2.f32 %v529_v23  ;;  %1277 = vmatprep.subr.bf16.mxu1 %v1491_v25  ;;  %v635_v42 = vsub.s32 3, %v1731_v27  ;;  %v1366_v43 = vld [vmem:[%s1870_s6 + $0x8] sm:$0xff]  }
 0x168   : > { %v1396_v48 = vpop.eup %1395 }
 0x169   : > { %v517_v50 = vmul.f32 %v1394_v41, %v509_v47  ;;  %v503_v51 = vmul.f32 %v1396_v48, %v483_v24  ;;  %v592_v60 = vsel %vm591_vm6, %v568_v49, %v590_v54  ;;  %v614_v24 = vsub.s32 0, %v1731_v27  ;;  %v766_v47 = vld [vmem:[%s388_s23] sm:$0xff] }
 0x16a   : > { %v1398_v52 = vpop.eup %1397  ;;  %v649_v49 = vsub.s32 5, %v1731_v27  ;;  %v663_v54 = vsub.s32 7, %v1731_v27 }
 0x16b   : > { %v511_v56 = vsub.f32 2.0, %v503_v51  ;;  %v502_v57 = vmul.f32 %v1398_v52, %v480_v31  ;;  %v572_v59 = vrot.slane %v517_v50, %v559_v37  ;;  %v836_v31 = vpop.f32.mrb[0].mxu0  ;;  %v1367_v50 = vld [vmem:[%s1870_s6 + $0x10] sm:$0xff]   ;;  %v1368_v51 = vld [vmem:[%s1870_s6 + $0x18] sm:$0xff]  }
 0x16c   : > { %v1400_v58 = vpop.eup %1399  ;;  %v837_v30 = vadd.f32 %v1215_v29, %v836_v31  ;;  %v1269_v33 = vpop.f32.mrb[1].mxu0  ;;  %1284 = vmatpush3.bf16.msra.mxu0 %v1367_v50 }
 0x16d   : > { %v519_v62 = vmul.f32 %v1396_v48, %v511_v56  ;;  %v504_v63 = vmul.f32 %v1400_v58, %v486_v36  ;;  %v510_v2 = vsub.f32 2.0, %v502_v57  ;;  %v594_v11 = vsel %vm593_vm7, %v572_v59, %v592_v60 }
 0x16e   : > { %v656_v36 = vsub.s32 6, %v1731_v27  ;;  %v842_v39 = vpack.c.bf16 %v837_v30, %v837_v30 }
 0x16f   : > { %v512_v6 = vsub.f32 2.0, %v504_v63  ;;  %v518_v8 = vmul.f32 %v1398_v52, %v510_v2  ;;  %v580_v12 = vrot.slane %v519_v62, %v559_v37 }
 0x170   : > { %v1402_v9 = vpop.eup %1401  ;;  %1274 = vmatmul.mubr.msk.bf16.vlgmr.msra.gmra.mrb[0].mxu1 %vm851_vm12, %v842_v39  ;;  %1286 = vmatmul.mubr.msk.bf16.vlgmr.msra.gmra.mrb[4].mxu0 %vm851_vm12, %v842_v39 }
 0x171   : > { %v520_v13 = vmul.f32 %v1400_v58, %v512_v6  ;;  %v576_v14 = vrot.slane %v518_v8, %v559_v37  ;;  %v505_v16 = vmul.f32 %v1402_v9, %v489_v44  ;;  %1279 = vmatprep.mubr.msk.bf16.mxu1 %vm1492_vm3, %v1491_v25  ;;  %1278 = vmatpush3.bf16.msra.mxu1 %v1366_v43  ;;  %v1404_v46 = vpop.eup %1403  ;;  %v1493_v6 = vmov 1  }
 0x172   : > { %1289 = vmatprep.subr.bf16.mxu1 %v1491_v25 }
 0x173   : > { %v584_v17 = vrot.slane %v520_v13, %v559_v37  ;;  %v596_v18 = vsel %vm595_vm8, %v576_v14, %v594_v11  ;;  %v513_v19 = vsub.f32 2.0, %v505_v16 }
 0x174   : > { %v598_v20 = vsel %vm597_vm9, %v580_v12, %v596_v18 }
 0x175   : > { %v521_v21 = vmul.f32 %v1402_v9, %v513_v19  ;;  %v600_v22 = vsel %vm599_vm10, %v584_v17, %v598_v20 }
 0x177   : > { %v588_v1 = vrot.slane %v521_v21, %v559_v37  ;;  %v628_v37 = vsub.s32 2, %v1731_v27 }
 0x178   : > { %1280 = vmatmul.mubr.msk.bf16.vlgmr.msra.gmra.mrb[4].mxu1 %vm851_vm12, %v842_v39 }
 0x179   : > { %v602_v26 = vsel %vm601_vm11, %v588_v1, %v600_v22  ;;  %1291 = vmatprep.mubr.msk.bf16.mxu1 %vm1492_vm3, %v1491_v25  ;;  %1290 = vmatpush3.bf16.msra.mxu1 %v1368_v51  ;;  %v539_v25 = vld [vmem:[#allocation3] sm:$0xff] }
 0x17a   : > { %v604_v28 = vmul.f32 %v1727_v15, %v602_v26  ;;  %v839_v15 = vpop.f32.mrb[2].mxu0  ;;  %v540_v57 = vmul.f32 %v1404_v46, %v539_v25 }
 0x17b   : > { %v1270_v38 = vpop.f32.mrb[3].mxu0 }
 0x17c   : > { %v622_v35 = vrot.slane %v604_v28, %v621_v4  ;;  %v615_v34 = vrot.slane %v604_v28, %v614_v24  ;;  %v657_v40 = vrot.slane %v604_v28, %v656_v36  ;;  %v629_v41 = vrot.slane %v604_v28, %v628_v37 }
 0x17d   : > { %v636_v44 = vrot.slane %v604_v28, %v635_v42  ;;  %v643_v48 = vrot.slane %v604_v28, %v642_v45  ;;  %v650_v52 = vrot.slane %v604_v28, %v649_v49  ;;  %v664_v56 = vrot.slane %v604_v28, %v663_v54 }
 0x17e   : > { %624 = vbcast.lane.b32.xlu1 %v622_v35, 256  ;;  %617 = vbcast.lane.b32.xlu0 %v615_v34, 256 }
 0x180   : > { %1292 = vmatmul.mubr.msk.bf16.vlgmr.msra.gmra.mrb[8].mxu1 %vm851_vm12, %v842_v39 }
 0x182   : > { %659 = vbcast.lane.b32.xlu1 %v657_v40, 256  ;;  %631 = vbcast.lane.b32.xlu0 %v629_v41, 256 }
 0x186   : > { %608 = vperm.xlu1 %1357, %v1404_v46   ;;  %638 = vbcast.lane.b32.xlu0 %v636_v44, 256 }
 0x18a   : > { %645 = vbcast.lane.b32.xlu0 %v643_v48, 256  ;;  %769 = vperm.xlu1 %1357, %v766_v47  }
 0x18e   : > { %652 = vbcast.lane.b32.xlu0 %v650_v52, 256 }
 0x192   : > { %666 = vbcast.lane.b32.xlu0 %v664_v56, 256 }
 0x1cb   : > { %v543_v58 = vpop.xlane.xlu0 %542 }
 0x1cc   : > { %v544_v59 = vadd.f32 %v543_v58, %v540_v57 }
 0x1ce   : > { %546 = vst.msk [vmem:[#allocation3] sm:$0xff] %vm394_vm0, %v544_v59 }
 0x1d5   : > { %v754_v60 = vld [vmem:[#allocation3] sm:$0xff] }
 0x1d6   : > { %1405 = vrcp.f32 %v754_v60 }
 0x1e0   : > { %v1406_v62 = vpop.eup %1405 }
 0x1e1   : > { %v756_v63 = vmul.f32 %v1406_v62, %v754_v60 }
 0x1e3   : > { %v757_v27 = vsub.f32 2.0, %v756_v63 }
 0x1e5   : > { %v758_v2 = vmul.f32 %v1406_v62, %v757_v27 }
 0x1e7   : > { %762 = vperm.xlu0 %1358, %v758_v2  }
 0x1eb   : > { %1359 = vset.pattern.permute.xlu0 %v1493_v6 }
 0x1f0   : > { %v625_v8 = vpop.permute.xlu1 %624  ;;  %v618_v9 = vpop.permute.xlu0 %617 }
 0x1f1   : > { %v669_v11 = vmul.f32 %v1691_v53, %v625_v8  ;;  %v668_v12 = vmul.f32 %v1693_v55, %v618_v9 }
 0x1f3   : > { %v683_v13 = vsel %vm397_vm2, %v669_v11, 0.0  ;;  %v676_v14 = vsel %vm397_vm2, %v668_v12, 0.0 }
 0x1f4   : > { %v684_v16 = vrot.slane %v683_v13, 4  ;;  %v677_v17 = vrot.slane %v676_v14, 4  ;;  %v660_v18 = vpop.permute.xlu1 %659  ;;  %v632_v19 = vpop.permute.xlu0 %631 }
 0x1f5   : > { %v670_v20 = vmul.f32 %v1701_v61, %v632_v19  ;;  %v674_v21 = vmul.f32 %v1715_v7, %v660_v18 }
 0x1f6   : > { %v685_v22 = vadd.f32 %v684_v16, %v683_v13  ;;  %v678_v1 = vadd.f32 %v677_v17, %v676_v14 }
 0x1f7   : > { %v690_v23 = vsel %vm397_vm2, %v670_v20, 0.0  ;;  %v718_v24 = vsel %vm397_vm2, %v674_v21, 0.0  ;;  %v605_v20 = vld [vmem:[#allocation4] sm:$0xff] }
 0x1f8   : > { %v691_v4 = vrot.slane %v690_v23, 4  ;;  %v639_v53 = vpop.permute.xlu0 %638  ;;  %v686_v28 = vrot.slane %v685_v22, 2  ;;  %v679_v31 = vrot.slane %v678_v1, 2  ;;  %v719_v30 = vrot.slane %v718_v24, 4 }
 0x1f9   : > { %v671_v55 = vmul.f32 %v1705_v0, %v639_v53 }
 0x1fa   : > { %v692_v26 = vadd.f32 %v691_v4, %v690_v23  ;;  %v687_v35 = vadd.f32 %v686_v28, %v685_v22  ;;  %v680_v37 = vadd.f32 %v679_v31, %v678_v1  ;;  %v720_v38 = vadd.f32 %v719_v30, %v718_v24 }
 0x1fb   : > { %v697_v29 = vsel %vm397_vm2, %v671_v55, 0.0 }
 0x1fc   : > { %v646_v32 = vpop.permute.xlu0 %645  ;;  %v693_v61 = vrot.slane %v692_v26, 2  ;;  %v698_v33 = vrot.slane %v697_v29, 4  ;;  %v688_v43 = vrot.slane %v687_v35, 1  ;;  %v681_v46 = vrot.slane %v680_v37, 1 }
 0x1fd   : > { %v672_v7 = vmul.f32 %v1711_v5, %v646_v32  ;;  %v721_v49 = vrot.slane %v720_v38, 2 }
 0x1fe   : > { %v699_v34 = vadd.f32 %v698_v33, %v697_v29  ;;  %v694_v39 = vadd.f32 %v693_v61, %v692_v26  ;;  %v689_v25 = vadd.f32 %v688_v43, %v687_v35 }
 0x1ff   : > { %v704_v36 = vsel %vm397_vm2, %v672_v7, 0.0  ;;  %v722_v62 = vadd.f32 %v721_v49, %v720_v38 }
 0x200   : > { %v705_v15 = vrot.slane %v704_v36, 4  ;;  %v653_v0 = vpop.permute.xlu0 %652  ;;  %v700_v40 = vrot.slane %v699_v34, 2  ;;  %v695_v50 = vrot.slane %v694_v39, 1 }
 0x201   : > { %v673_v41 = vmul.f32 %v1709_v3, %v653_v0  ;;  %v682_v3 = vadd.f32 %v681_v46, %v680_v37  ;;  %v723_v12 = vrot.slane %v722_v62, 1 }
 0x202   : > { %v706_v42 = vadd.f32 %v705_v15, %v704_v36  ;;  %v701_v44 = vadd.f32 %v700_v40, %v699_v34  ;;  %v696_v63 = vadd.f32 %v695_v50, %v694_v39 }
 0x203   : > { %v711_v45 = vsel %vm397_vm2, %v673_v41, 0.0  ;;  %v740_v9 = vsel %vm589_vm5, %v689_v25, %v682_v3  ;;  %v724_v23 = vadd.f32 %v723_v12, %v722_v62  ;;  %v1227_v25 = vld [vmem:[%s1871_s7] ss:$0 sm:$0xff] }
 0x204   : > { %v707_v47 = vrot.slane %v706_v42, 2  ;;  %v712_v5 = vrot.slane %v711_v45, 4  ;;  %v667_v48 = vpop.permute.xlu0 %666  ;;  %v702_v52 = vrot.slane %v701_v44, 1  ;;  %v741_v13 = vsel %vm591_vm6, %v696_v63, %v740_v9 }
 0x205   : > { %v675_v51 = vmul.f32 %v1721_v10, %v667_v48  ;;  %v609_v21 = vpop.permute.xlu1 %608 }
 0x206   : > { %v708_v54 = vadd.f32 %v707_v47, %v706_v42  ;;  %v713_v56 = vadd.f32 %v712_v5, %v711_v45  ;;  %v703_v27 = vadd.f32 %v702_v52, %v701_v44  ;;  %v611_v4 = vmul.f32 %v609_v21, %v605_v20 }
 0x207   : > { %v725_v57 = vsel %vm397_vm2, %v675_v51, 0.0  ;;  %v1494_v44 = vmov 2   ;;  %v1495_v45 = vmov 3  }
 0x208   : > { %v709_v58 = vrot.slane %v708_v54, 1  ;;  %v714_v59 = vrot.slane %v713_v56, 2  ;;  %v726_v60 = vrot.slane %v725_v57, 4  ;;  %v742_v14 = vsel %vm593_vm7, %v703_v27, %v741_v13 }
 0x209   : > { %v770_v42 = vpop.permute.xlu1 %769 }
 0x20a   : > { %v715_v2 = vadd.f32 %v714_v59, %v713_v56  ;;  %v727_v6 = vadd.f32 %v726_v60, %v725_v57  ;;  %v710_v8 = vadd.f32 %v709_v58, %v708_v54 }
 0x20c   : > { %v716_v11 = vrot.slane %v715_v2, 1  ;;  %v728_v10 = vrot.slane %v727_v6, 2  ;;  %v743_v18 = vsel %vm595_vm8, %v710_v8, %v742_v14 }
 0x20e   : > { %v717_v16 = vadd.f32 %v716_v11, %v715_v2  ;;  %v729_v17 = vadd.f32 %v728_v10, %v727_v6 }
 0x210   : > { %v730_v19 = vrot.slane %v729_v17, 1  ;;  %v744_v22 = vsel %vm597_vm9, %v717_v16, %v743_v18 }
 0x211   : > { %v745_v53 = vsel %vm599_vm10, %v724_v23, %v744_v22 }
 0x212   : > { %v731_v1 = vadd.f32 %v730_v19, %v729_v17 }
 0x214   : > { %v746_v55 = vsel %vm601_vm11, %v731_v1, %v745_v53 }
 0x215   : > { %v748_v24 = vadd.f32 %v746_v55, %v611_v4 }
 0x217   : > { %749 = vst.msk [vmem:[#allocation4] sm:$0xff] %vm397_vm2, %v748_v24 }
 0x21e   : > { %v759_v38 = vld [vmem:[#allocation4] sm:$0xff] }
 0x243   : > { %v889_v26 = vpop.f32.mrb[0].mxu1  ;;  %v998_v7 = vpop.f32.mrb[4].mxu0 }
 0x244   : > { %v1275_v28 = vpop.f32.mrb[1].mxu1  ;;  %v1287_v34 = vpop.f32.mrb[5].mxu0 }
 0x245   : > { %v892_v29 = vpop.f32.mrb[2].mxu1  ;;  %v1001_v37 = vpop.f32.mrb[6].mxu0 }
 0x246   : > { %v1276_v31 = vpop.f32.mrb[3].mxu1  ;;  %v1288_v0 = vpop.f32.mrb[7].mxu0 }
 0x24b   : > { %v944_v32 = vpop.f32.mrb[4].mxu1 }
 0x24c   : > { %v1281_v30 = vpop.f32.mrb[5].mxu1 }
 0x24d   : > { %v947_v61 = vpop.f32.mrb[6].mxu1 }
 0x24e   : > { %v1282_v33 = vpop.f32.mrb[7].mxu1 }
 0x253   : > { %v1052_v35 = vpop.f32.mrb[8].mxu1 }
 0x254   : > { %v1293_v36 = vpop.f32.mrb[9].mxu1 }
 0x255   : > { %v1055_v15 = vpop.f32.mrb[10].mxu1 }
 0x256   : > { %v1294_v40 = vpop.f32.mrb[11].mxu1 }
 0x266   : > { %v763_v39 = vpop.permute.xlu0 %762 }
 0x267   : > { %v765_v41 = vmul.f32 %v763_v39, %v759_v38 }
 0x269   : > { %v772_v43 = vmul.f32 %v770_v42, %v765_v41 }
 0x26b   : > { %951 = vperm.xlu0 %1359, %v772_v43   ;;  %897 = vperm.xlu1 %1357, %v772_v43  }
 0x26f   : > { %1360 = vset.pattern.permute.xlu1 %v1494_v44  ;;  %1362 = vset.pattern.permute.xlu0 %v1495_v45 }
 0x270   : > { %1005 = vperm.xlu1 %1360, %v772_v43  }
 0x274   : > { %1361 = vset.pattern.permute.xlu1 %v1495_v45 }
 0x275   : > { %1059 = vperm.xlu1 %1361, %v772_v43  }
 0x2ea   : > { %v952_v46 = vpop.permute.xlu0 %951  ;;  %v898_v47 = vpop.permute.xlu1 %897 }
 0x2eb   : > { %v954_v5 = vmul.f32 %v952_v46, %v944_v32  ;;  %v900_v48 = vmul.f32 %v898_v47, %v889_v26 }
 0x2ed   : > { %v955_v49 = vadd.f32 %v954_v5, %v900_v48 }
 0x2ef   : > { %v1006_v50 = vpop.permute.xlu1 %1005 }
 0x2f0   : > { %v1008_v51 = vmul.f32 %v1006_v50, %v998_v7 }
 0x2f2   : > { %v1009_v52 = vadd.f32 %v1008_v51, %v955_v49 }
 0x2f4   : > { %v1060_v54 = vpop.permute.xlu1 %1059 }
 0x2f5   : > { %v1062_v56 = vmul.f32 %v1060_v54, %v1052_v35 }
 0x2f7   : > { %v1063_v57 = vadd.f32 %v1062_v56, %v1009_v52 }
 0x2f9   : > { %v1071_v3 = vadd.f32 %v1227_v25, %v1063_v57 }
 0x2fb   : > { %v1073_v58 = vmul.f32 0.70710677, %v1071_v3  ;;  %v1072_v60 = vmul.f32 0.5, %v1071_v3 }
 0x2fd   : > { %1407 = verf.f32 %v1073_v58 }
 0x307   : > { %v1408_v59 = vpop.eup %1407 }
 0x308   : > { %v1075_v62 = vadd.f32 1.0, %v1408_v59 }
 0x30a   : > { %v1076_v63 = vmul.f32 %v1075_v62, %v1072_v60 }
 0x30c   : > { %1077 = vst.msk [vmem:[%s365_s21] sm:$0xff] %vm798_vm4, %v1076_v63 }
 0x30d   : > { %1422 = shalt.err (!%p1419_p5)
}
 0x30e   : > { %s1423_s12 = scalar_lea.hbm %s1816_s24, 128  ;;  %s1427_s21 = scalar_lea.hbm %s1872_s8, 256 }
 0x30f   : > { %p1424_p6 = scmp.ne.s32.totalorder %s1816_s24, %s1423_s12  ;;  %p1428_p10 = scmp.lt.u32.totalorder %s1816_s24, %s1872_s8 }
 0x310   : > { %p1429_p11 = scmp.lt.u32.totalorder %s1427_s21, %s1423_s12  ;;  %p1431_p13 = scmp.lt.u32.totalorder %s1423_s12, %s1816_s24 }
 0x311   : > { %p1425_p7 = pnand %p1424_p6, %p1582_p4 }
 0x312   : > { %p1430_p12 = por %p1429_p11, %p1428_p10 }
 0x313   : > { %p1426_p9 = pneg %p1425_p7 }
 0x314   : > { %p1432_p0 = por %p1431_p13, %p1430_p12 }
 0x316   : > { %p1433_p1 = pnand %p1432_p0, %p1426_p9 }
 0x318   : > { %1436 = shalt.err (!%p1433_p1)
}
 0x319   : > { %1295 = dma.vmem_to_hbm [thread:$0]  (%p1582_p4), %s1818_s22, 128, %s1816_s24, %s1079_s16  }
 0x31a PF: > { %p1301_p2 = scmp.ge.s32.totalorder %s1487_s10, 2  ;;  %s1104_s25 = sand.u32 1, %s1467_s27  }
 0x31b   : > { %s1105_s30 = scalar_lea.sflag [#allocation6], %s1104_s25 }
 0x31c   : > { %p1298_p3 = pnand %p1301_p2, %p1589_p8 }
 0x31e   : > { %1462 = dma.done.wait (!%p1298_p3), %s1105_s30, 128  }
 0x31f   : > { %1464 = vsyncadd (!%p1298_p3), %s1105_s30, 4294967168  ;;  %s21_s10 = sadd.s32 1, %s1487_s10   ;;  %s1875_s27 = smov %s1471_s28 }
 0x320   : > { %p18_p5 = scmp.ge.s32.totalorder %s21_s10, 4   ;;  %s1876_s28 = smov %s1475_s29 }
 0x321   : > { %s1877_s29 = smov %s1595_s18  ;;  %s1878_s30 = smov %s1483_s9 }
 0x322   : > { %s1879_s9 = smov %s1881_s13  ;;  %20 = sbr.rel (!%p18_p5) target bundleno = 4 (0x4), region = 104 }
 0x329   :  { %1110 = vsyncpa [#allocation6], 1 }
 0x32a   :  { %1112 = vsyncpa [#allocation6 + $0x1], 1 }

// kernel: tpu_custom_call.1
= control target key start
LH: loop header
LB: loop body
LE: loop exit
PB: predicated region body
PF: predicated region fallthrough
CT: control target
= control target key end

     0   :  { %13 = vsyncpa [#allocation6], 0  ;;  %s1864_s0 = inlined_call_operand.vmem [shape: f32[16,32], index: 0, kind: input, shape index: {}]   ;;  %s1865_s1 = inlined_call_operand.vmem [shape: bf16[2,8,8], index: 1, kind: input, shape index: {}]   ;;  %s1866_s2 = inlined_call_operand.vmem [shape: bf16[2,8,8,4], index: 2, kind: input, shape index: {}]   ;;  %s1867_s3 = inlined_call_operand.vmem [shape: f32[2,8,1], index: 3, kind: input, shape index: {}]   ;;  %s1868_s4 = inlined_call_operand.vmem [shape: bf16[32,16], index: 4, kind: input, shape index: {}]   ;;  %s1869_s5 = inlined_call_operand.vmem [shape: f32[1,16], index: 5, kind: input, shape index: {}]   ;;  %s1870_s6 = inlined_call_operand.vmem [shape: bf16[64,32], index: 6, kind: input, shape index: {}]   ;;  %s1871_s7 = inlined_call_operand.vmem [shape: f32[1,32], index: 7, kind: input, shape index: {}]   ;;  %s1872_s8 = inlined_call_operand.hbm [shape: f32[16,32], index: 8, kind: output, shape index: {}]  }
   0x1   :  { %15 = vsyncpa [#allocation6 + $0x1], 0  ;;  %s1542_s27 = smov 0   ;;  %s1544_s28 = smov 0  }
   0x2   :  { %s1546_s29 = smov 0   ;;  %s1548_s30 = smov 0  }
   0x3   :  { %s1550_s9 = smov 0   ;;  %s1552_s10 = smov 0  }
   0x4 LB: > { %s1204_s11 = sadd.s32 4294967295, %s1487_s10   ;;  %s1205_s12 = sadd.s32 4294967294, %s1487_s10   ;;  %s1487_s10 = sphi %s1552_s10, %s21_s10   ;;  %s1483_s9 = sphi %s1550_s9, %s1879_s9   ;;  %s1479_s30 = sphi %s1548_s30, %s1878_s30   ;;  %s1475_s29 = sphi %s1546_s29, %s1877_s29   ;;  %s1471_s28 = sphi %s1544_s28, %s1876_s28   ;;  %s1467_s27 = sphi %s1542_s27, %s1875_s27  }
   0x5   : > { %s33_s13 = sadd.s32 1, %s1483_s9  ;;  %s232_s14 = sadd.s32 1, %s1475_s29 }
   0x6   : > { %p35_p0 = scmp.ge.s32.totalorder %s33_s13, 2  ;;  %p242_p1 = scmp.ne.s32.totalorder %s1475_s29, %s1471_s28 }
   0x7   : > { %p243_p2 = scmp.eq.s32.totalorder %s1204_s11, 1  ;;  %p248_p3 = scmp.ne.s32.totalorder %s1471_s28, %s1467_s27 }
   0x8   : > { %s1881_s13 = smov (%p35_p0, %s33_s13), 0  ;;  %p249_p5 = scmp.eq.s32.totalorder %s1205_s12, 1 }
   0x9   : > { %p1582_p4 = por %p243_p2, %p242_p1  ;;  %s229_s16 = ssub.s32 %s1483_s9, %s1881_s13 }
   0xa   : > { %p1208_p6 = scmp.ge.s32.totalorder %s1487_s10, 1  ;;  %p230_p7 = scmp.eq.s32.totalorder %s229_s16, 0 }
   0xb   : > { %p1589_p8 = por %p249_p5, %p248_p3  ;;  %p314_p9 = scmp.lt.s32.totalorder %s1487_s10, 3 }
   0xc   : > { %s1595_s18 = scalar_select %p230_p7, %s1475_s29, %s232_s14  }
   0xd   : > { %p315_p10 = pnand %p1208_p6, %p314_p9 }
   0xe   : > { %p366_p11 = scmp.lt.s32.totalorder (!%p315_p10), %s1479_s30, 1  ;;  %vm394_vm0 = vcmask (!%p315_p10), 7168   ;;  %v1489_v0 = vmov (!%p315_p10), -inf   ;;  %vm523_vm1 = vcmask (!%p315_p10), 64512   ;;  %vm397_vm2 = vcmask (!%p315_p10), 31744   ;;  %v1363_v26 = vld [vmem:[%s1868_s4] sm:$0xff] (!%p315_p10)  }
   0xf   : > { %318 = sbr.rel (%p315_p10) target bundleno = 794 (0x31a), region = 52  ;;  %395 = vst.msk [vmem:[#allocation2] sm:$0xff] (!%p315_p10), %vm394_vm0, %v1489_v0  ;;  %v1490_v24 = vmov (!%p315_p10), 0   ;;  %v1491_v25 = vmov (!%p315_p10), 0.0   ;;  %vm1492_vm3 = vmmov (!%p315_p10), 0   ;;  %v1364_v27 = vld [vmem:[%s1868_s4 + $0x8] sm:$0xff] (!%p315_p10)  }
  0x10   : > { %1357 = vset.pattern.permute.xlu1 (!%p315_p10), %v1490_v24  ;;  %1358 = vset.pattern.permute.xlu0 (!%p315_p10), %v1490_v24  ;;  %396 = vst.msk [vmem:[#allocation3] sm:$0xff] (!%p315_p10), %vm394_vm0, %v1491_v25  ;;  %vm798_vm4 = vcmask (!%p315_p10), 261120   ;;  %vm589_vm5 = vcmask (!%p315_p10), 1041409   ;;  %vm591_vm6 = vcmask (!%p315_p10), 1042434   ;;  %vm593_vm7 = vcmask (!%p315_p10), 1043459   ;;  %s363_s12 = sand.u32 (!%p315_p10), 1, %s1471_s28  }
  0x11   : > { %1263 = vmatprep.subr.bf16.mxu0 (!%p315_p10), %v1491_v25  ;;  %398 = vst.msk [vmem:[#allocation4] sm:$0xff] (!%p315_p10), %vm397_vm2, %v1491_v25  ;;  %1271 = vmatprep.subr.bf16.mxu1 (!%p315_p10), %v1491_v25  ;;  %vm595_vm8 = vcmask (!%p315_p10), 1044484   ;;  %vm597_vm9 = vcmask (!%p315_p10), 1045509   ;;  %vm599_vm10 = vcmask (!%p315_p10), 1046534   ;;  %vm601_vm11 = vcmask (!%p315_p10), 1047559   ;;  %s1209_s14 = sshll.u32 (!%p315_p10), %s363_s12, 3 }
  0x12   : > { %1267 = vmatprep.mubr.msk.bf16.mxu0 (!%p315_p10), %vm1492_vm3, %v1491_v25  ;;  %1273 = vmatprep.mubr.msk.bf16.mxu1 (!%p315_p10), %vm1492_vm3, %v1491_v25  ;;  %vm851_vm12 = vcmask (!%p315_p10), 130048  }
  0x13   : > { %1264 = vmatpush3.bf16.msra.mxu0 (!%p315_p10), %v1363_v26 }
  0x14   : > { %1265 = vmatprep.subr.bf16.mxu0 (!%p315_p10), %v1491_v25 }
  0x16   : > { %s1600_s19 = scalar_select %p366_p11, %s1479_s30, 1  ;;  %v1675_v30 = vld [vmem:[#allocation2] sm:$0xff] }
  0x17   : > { %1266 = vmatpush3.bf16.msra.mxu0 %v1364_v27 }
  0x18   : > { %s1211_s20 = sshll.u32 %s1600_s19, 2  ;;  %s1232_s21 = sshll.u32 %s1600_s19, 5  ;;  %1283 = vmatprep.subr.bf16.mxu0 %v1491_v25 }
  0x19   : > { %s376_s24 = scalar_lea.vmem %s1865_s1, %s1211_s20  ;;  %s384_s11 = scalar_lea.vmem %s1866_s2, %s1232_s21 }
  0x1a   : > { %v1610_v1 = vld [vmem:[%s376_s24] sm:$0xf]  ;;  %v1614_v3 = vld [vmem:[%s384_s11 + $0x8] sm:$0xff]   ;;  %v1620_v8 = vld [vmem:[%s384_s11 + $0x10] sm:$0xff]   ;;  %s1210_s16 = sshll.u32 %s1600_s19, 3  ;;  %s1229_s20 = sshll.u32 %s1479_s30, 7 }
  0x1b   : > { %v1612_v2 = vld [vmem:[%s384_s11] sm:$0xff]   ;;  %v400_v4 = vunpack.c.l.bf16 %v1610_v1  ;;  %v1239_v7 = vunpack.c.l.bf16 %v1614_v3  ;;  %v1240_v13 = vunpack.c.h.bf16 %v1614_v3  ;;  %v1243_v14 = vunpack.c.l.bf16 %v1620_v8  ;;  %v1634_v15 = vld [vmem:[%s384_s11 + $0x18] sm:$0xff]   ;;  %s369_s22 = scalar_lea.vmem %s1864_s0, %s1210_s16  ;;  %s388_s23 = scalar_lea.vmem %s1867_s3, %s1210_s16 }
  0x1c   : > { %v1235_v5 = vunpack.c.l.bf16 %v1612_v2  ;;  %v1236_v6 = vunpack.c.h.bf16 %v1612_v2  ;;  %v1244_v18 = vunpack.c.h.bf16 %v1620_v8  ;;  %v1247_v19 = vunpack.c.l.bf16 %v1634_v15  ;;  %v773_v28 = vld [vmem:[%s369_s22] sm:$0xff]  ;;  %s365_s21 = scalar_lea.vmem [#allocation5], %s1209_s14  ;;  %s1816_s24 = scalar_lea.hbm %s1872_s8, %s1229_s20 }
  0x1d   : > { %v524_v9 = vsel %vm523_vm1, %v400_v4, -inf  ;;  %v424_v12 = vsel %vm397_vm2, %v1239_v7, -inf  ;;  %v427_v16 = vsel %vm397_vm2, %v1240_v13, -inf  ;;  %v430_v17 = vsel %vm397_vm2, %v1243_v14, -inf  ;;  %s1092_s22 = sshll.u32 %s365_s21, 4  ;;  %s1079_s16 = scalar_lea.sflag [#allocation6], %s363_s12  ;;  %s1818_s22 = int_to_ptr.vmem [resolvable:$true] %s1092_s22 }
  0x1e   : > { %v421_v10 = vsel %vm397_vm2, %v1236_v6, -inf  ;;  %525 = vmax.xlane.f32.xlu0 %v524_v9  ;;  %v418_v11 = vsel %vm397_vm2, %v1235_v5, -inf  ;;  %v433_v20 = vsel %vm397_vm2, %v1244_v18, -inf  ;;  %v436_v21 = vsel %vm397_vm2, %v1247_v19, -inf  ;;  %s1409_s25 = scalar_lea.vmem %s1818_s22, 128  ;;  %s1496_s30 = smov [#allocation5]  }
  0x1f   : > { %422 = vmax.xlane.f32.xlu1 %v421_v10  ;;  %v1248_v22 = vunpack.c.h.bf16 %v1634_v15  ;;  %v774_v29 = vpack.c.bf16 %v773_v28, %v773_v28  ;;  %p1410_p12 = scmp.ne.s32.totalorder %s1818_s22, %s1409_s25  ;;  %s1413_s26 = sshll.u32 %s1496_s30, 4  ;;  %s1414_s26 = int_to_ptr.vmem [resolvable:$false] %s1413_s26 }
  0x20   : > { %s1415_s11 = scalar_lea.vmem %s1414_s26, 256  ;;  %p1416_p1 = scmp.lt.s32.totalorder %s1818_s22, %s1414_s26 }
  0x21   : > { %v439_v23 = vsel %vm397_vm2, %v1248_v22, -inf  ;;  %1268 = vmatmul.mubr.msk.bf16.vlgmr.msra.gmra.mrb[0].mxu0 %vm798_vm4, %v774_v29  ;;  %p1411_p13 = pnand %p1410_p12, %p1582_p4  ;;  %p1417_p2 = scmp.lt.s32.totalorder %s1415_s11, %s1409_s25 }
  0x22   : > { %419 = vmax.xlane.f32.xlu0 %v418_v11  ;;  %1285 = vmatprep.mubr.msk.bf16.mxu0 %vm1492_vm3, %v1491_v25 }
  0x23   : > { %425 = vmax.xlane.f32.xlu1 %v424_v12  ;;  %p1412_p0 = pneg %p1411_p13  ;;  %p1418_p3 = por %p1417_p2, %p1416_p1 }
  0x25   : > { %p1419_p5 = pnand %p1418_p3, %p1412_p0 }
  0x26   : > { %428 = vmax.xlane.f32.xlu0 %v427_v16 }
  0x27   : > { %431 = vmax.xlane.f32.xlu1 %v430_v17 }
  0x2a   : > { %434 = vmax.xlane.f32.xlu0 %v433_v20 }
  0x2b   : > { %437 = vmax.xlane.f32.xlu1 %v436_v21 }
  0x2e   : > { %440 = vmax.xlane.f32.xlu0 %v439_v23 }
  0xab   : > { %v526_v31 = vpop.xlane.xlu0 %525 }
  0xac   : > { %v423_v32 = vpop.xlane.xlu1 %422  ;;  %v1678_v33 = vmax.f32 %v1675_v30, %v526_v31 }
  0xad   : > { %v443_v34 = vsub.f32 %v1236_v6, %v423_v32 }
  0xae   : > { %v528_v35 = vsub.f32 %v1675_v30, %v1678_v33  ;;  %750 = vst.msk [vmem:[#allocation2] sm:$0xff] %vm394_vm0, %v1678_v33  ;;  %533 = vperm.xlu1 %1357, %v1678_v33  }
  0xaf   : > { %v420_v36 = vpop.xlane.xlu0 %419  ;;  %v452_v37 = vmul.f32 1.442695, %v443_v34 }
  0xb0   : > { %v426_v38 = vpop.xlane.xlu1 %425  ;;  %v442_v39 = vsub.f32 %v1235_v5, %v420_v36 }
  0xb1   : > { %v444_v40 = vsub.f32 %v1239_v7, %v426_v38  ;;  %1369 = vpow2.f32 %v452_v37 }
  0xb2   : > { %v450_v41 = vmul.f32 1.442695, %v442_v39 }
  0xb3   : > { %v429_v42 = vpop.xlane.xlu0 %428  ;;  %v454_v44 = vmul.f32 1.442695, %v444_v40 }
  0xb4   : > { %v432_v43 = vpop.xlane.xlu1 %431  ;;  %1371 = vpow2.f32 %v450_v41  ;;  %v445_v45 = vsub.f32 %v1240_v13, %v429_v42 }
  0xb5   : > { %1373 = vpow2.f32 %v454_v44  ;;  %v446_v50 = vsub.f32 %v1243_v14, %v432_v43 }
  0xb6   : > { %v456_v47 = vmul.f32 1.442695, %v445_v45 }
  0xb7   : > { %v435_v46 = vpop.xlane.xlu0 %434  ;;  %v458_v56 = vmul.f32 1.442695, %v446_v50 }
  0xb8   : > { %v447_v48 = vsub.f32 %v1244_v18, %v435_v46  ;;  %v438_v49 = vpop.xlane.xlu1 %437  ;;  %1375 = vpow2.f32 %v456_v47 }
  0xb9   : > { %v448_v52 = vsub.f32 %v1247_v19, %v438_v49 }
  0xba   : > { %v460_v51 = vmul.f32 1.442695, %v447_v48 }
  0xbb   : > { %v1691_v53 = vpop.eup %1369  ;;  %v441_v54 = vpop.xlane.xlu0 %440  ;;  %v462_v58 = vmul.f32 1.442695, %v448_v52 }
  0xbc   : > { %1377 = vpow2.f32 %v460_v51  ;;  %v449_v59 = vsub.f32 %v1248_v22, %v441_v54  ;;  %v469_v60 = vsel %vm397_vm2, %v1691_v53, 0.0  ;;  %v555_v22 = vlaneseq }
  0xbd   : > { %1379 = vpow2.f32 %v458_v56 }
  0xbe   : > { %v1693_v55 = vpop.eup %1371  ;;  %1381 = vpow2.f32 %v462_v58  ;;  %v464_v62 = vmul.f32 1.442695, %v449_v59  ;;  %v556_v26 = vand.u32 127, %v555_v22  ;;  %v1731_v27 = vshrl.u32 %v555_v22, 7 }
  0xbf   : > { %v466_v57 = vsel %vm397_vm2, %v1693_v55, 0.0  ;;  %v1701_v61 = vpop.eup %1373 }
  0xc0   : > { %467 = vadd.xlane.f32.xlu0 %v466_v57  ;;  %v472_v63 = vsel %vm397_vm2, %v1701_v61, 0.0  ;;  %1383 = vpow2.f32 %v464_v62  ;;  %v559_v37 = vsub.s32 %v556_v26, %v1731_v27 }
  0xc2   : > { %v1705_v0 = vpop.eup %1375 }
  0xc3   : > { %v475_v2 = vsel %vm397_vm2, %v1705_v0, 0.0 }
  0xc4   : > { %470 = vadd.xlane.f32.xlu0 %v469_v60 }
  0xc6   : > { %v1709_v3 = vpop.eup %1377 }
  0xc7   : > { %v1711_v5 = vpop.eup %1379  ;;  %v481_v6 = vsel %vm397_vm2, %v1709_v3, 0.0 }
  0xc8   : > { %473 = vadd.xlane.f32.xlu0 %v472_v63  ;;  %v1715_v7 = vpop.eup %1381  ;;  %v478_v8 = vsel %vm397_vm2, %v1711_v5, 0.0 }
  0xc9   : > { %v484_v9 = vsel %vm397_vm2, %v1715_v7, 0.0 }
  0xca   : > { %v1721_v10 = vpop.eup %1383 }
  0xcb   : > { %v487_v11 = vsel %vm397_vm2, %v1721_v10, 0.0 }
  0xcc   : > { %476 = vadd.xlane.f32.xlu0 %v475_v2 }
  0xd0   : > { %482 = vadd.xlane.f32.xlu0 %v481_v6 }
  0xd2   : > { %479 = vadd.xlane.f32.xlu1 %v478_v8 }
  0xd4   : > { %485 = vadd.xlane.f32.xlu0 %v484_v9 }
  0xd8   : > { %488 = vadd.xlane.f32.xlu0 %v487_v11 }
 0x12d   : > { %v534_v12 = vpop.permute.xlu1 %533 }
 0x12e   : > { %v536_v13 = vsub.f32 %v400_v4, %v534_v12 }
 0x130   : > { %v537_v14 = vmul.f32 1.442695, %v536_v13 }
 0x132   : > { %1385 = vpow2.f32 %v537_v14 }
 0x13c   : > { %v1727_v15 = vpop.eup %1385 }
 0x13d   : > { %v541_v16 = vsel %vm523_vm1, %v1727_v15, 0.0 }
 0x13e   : > { %542 = vadd.xlane.f32.xlu0 %v541_v16 }
 0x14d   : > { %v468_v17 = vpop.xlane.xlu0 %467 }
 0x14e   : > { %1387 = vrcp.f32 %v468_v17 }
 0x151   : > { %v471_v18 = vpop.xlane.xlu0 %470 }
 0x152   : > { %1389 = vrcp.f32 %v471_v18 }
 0x155   : > { %v474_v19 = vpop.xlane.xlu0 %473 }
 0x156   : > { %1391 = vrcp.f32 %v474_v19 }
 0x158   : > { %v1388_v20 = vpop.eup %1387 }
 0x159   : > { %v477_v21 = vpop.xlane.xlu0 %476  ;;  %v498_v23 = vmul.f32 %v1388_v20, %v468_v17 }
 0x15a   : > { %1393 = vrcp.f32 %v477_v21 }
 0x15b   : > { %v506_v28 = vsub.f32 2.0, %v498_v23  ;;  %v529_v23 = vmul.f32 1.442695, %v528_v35 }
 0x15c   : > { %v1390_v1 = vpop.eup %1389 }
 0x15d   : > { %v499_v4 = vmul.f32 %v1390_v1, %v471_v18  ;;  %v483_v24 = vpop.xlane.xlu0 %482  ;;  %v514_v38 = vmul.f32 %v1388_v20, %v506_v28 }
 0x15e   : > { %1395 = vrcp.f32 %v483_v24 }
 0x15f   : > { %v507_v29 = vsub.f32 2.0, %v499_v4  ;;  %v480_v31 = vpop.xlane.xlu1 %479  ;;  %v560_v45 = vrot.slane %v514_v38, %v559_v37  ;;  %v621_v4 = vsub.s32 1, %v1731_v27 }
 0x160   : > { %v1392_v32 = vpop.eup %1391  ;;  %1397 = vrcp.f32 %v480_v31 }
 0x161   : > { %v500_v34 = vmul.f32 %v1392_v32, %v474_v19  ;;  %v486_v36 = vpop.xlane.xlu0 %485  ;;  %v515_v39 = vmul.f32 %v1390_v1, %v507_v29  ;;  %v1215_v29 = vld [vmem:[%s1869_s5] ss:$0 sm:$0xff] }
 0x162   : > { %1399 = vrcp.f32 %v486_v36 }
 0x163   : > { %v508_v40 = vsub.f32 2.0, %v500_v34  ;;  %v564_v46 = vrot.slane %v515_v39, %v559_v37 }
 0x164   : > { %v1394_v41 = vpop.eup %1393 }
 0x165   : > { %v516_v42 = vmul.f32 %v1392_v32, %v508_v40  ;;  %v501_v43 = vmul.f32 %v1394_v41, %v477_v21  ;;  %v489_v44 = vpop.xlane.xlu0 %488  ;;  %v590_v54 = vsel %vm589_vm5, %v564_v46, %v560_v45  ;;  %v1365_v32 = vld [vmem:[%s1870_s6] sm:$0xff]   ;;  %v642_v45 = vsub.s32 4, %v1731_v27 }
 0x166   : > { %1401 = vrcp.f32 %v489_v44  ;;  %1272 = vmatpush3.bf16.msra.mxu1 %v1365_v32 }
 0x167   : > { %v509_v47 = vsub.f32 2.0, %v501_v43  ;;  %v568_v49 = vrot.slane %v516_v42, %v559_v37  ;;  %1403 = vpow2.f32 %v529_v23  ;;  %1277 = vmatprep.subr.bf16.mxu1 %v1491_v25  ;;  %v635_v42 = vsub.s32 3, %v1731_v27  ;;  %v1366_v43 = vld [vmem:[%s1870_s6 + $0x8] sm:$0xff]  }
 0x168   : > { %v1396_v48 = vpop.eup %1395 }
 0x169   : > { %v517_v50 = vmul.f32 %v1394_v41, %v509_v47  ;;  %v503_v51 = vmul.f32 %v1396_v48, %v483_v24  ;;  %v592_v60 = vsel %vm591_vm6, %v568_v49, %v590_v54  ;;  %v614_v24 = vsub.s32 0, %v1731_v27  ;;  %v766_v47 = vld [vmem:[%s388_s23] sm:$0xff] }
 0x16a   : > { %v1398_v52 = vpop.eup %1397  ;;  %v649_v49 = vsub.s32 5, %v1731_v27  ;;  %v663_v54 = vsub.s32 7, %v1731_v27 }
 0x16b   : > { %v511_v56 = vsub.f32 2.0, %v503_v51  ;;  %v502_v57 = vmul.f32 %v1398_v52, %v480_v31  ;;  %v572_v59 = vrot.slane %v517_v50, %v559_v37  ;;  %v836_v31 = vpop.f32.mrb[0].mxu0  ;;  %v1367_v50 = vld [vmem:[%s1870_s6 + $0x10] sm:$0xff]   ;;  %v1368_v51 = vld [vmem:[%s1870_s6 + $0x18] sm:$0xff]  }
 0x16c   : > { %v1400_v58 = vpop.eup %1399  ;;  %v837_v30 = vadd.f32 %v1215_v29, %v836_v31  ;;  %v1269_v33 = vpop.f32.mrb[1].mxu0  ;;  %1284 = vmatpush3.bf16.msra.mxu0 %v1367_v50 }
 0x16d   : > { %v519_v62 = vmul.f32 %v1396_v48, %v511_v56  ;;  %v504_v63 = vmul.f32 %v1400_v58, %v486_v36  ;;  %v510_v2 = vsub.f32 2.0, %v502_v57  ;;  %v594_v11 = vsel %vm593_vm7, %v572_v59, %v592_v60 }
 0x16e   : > { %v656_v36 = vsub.s32 6, %v1731_v27  ;;  %v842_v39 = vpack.c.bf16 %v837_v30, %v837_v30 }
 0x16f   : > { %v512_v6 = vsub.f32 2.0, %v504_v63  ;;  %v518_v8 = vmul.f32 %v1398_v52, %v510_v2  ;;  %v580_v12 = vrot.slane %v519_v62, %v559_v37 }
 0x170   : > { %v1402_v9 = vpop.eup %1401  ;;  %1274 = vmatmul.mubr.msk.bf16.vlgmr.msra.gmra.mrb[0].mxu1 %vm851_vm12, %v842_v39  ;;  %1286 = vmatmul.mubr.msk.bf16.vlgmr.msra.gmra.mrb[4].mxu0 %vm851_vm12, %v842_v39 }
 0x171   : > { %v520_v13 = vmul.f32 %v1400_v58, %v512_v6  ;;  %v576_v14 = vrot.slane %v518_v8, %v559_v37  ;;  %v505_v16 = vmul.f32 %v1402_v9, %v489_v44  ;;  %1279 = vmatprep.mubr.msk.bf16.mxu1 %vm1492_vm3, %v1491_v25  ;;  %1278 = vmatpush3.bf16.msra.mxu1 %v1366_v43  ;;  %v1404_v46 = vpop.eup %1403  ;;  %v1493_v6 = vmov 1  }
 0x172   : > { %1289 = vmatprep.subr.bf16.mxu1 %v1491_v25 }
 0x173   : > { %v584_v17 = vrot.slane %v520_v13, %v559_v37  ;;  %v596_v18 = vsel %vm595_vm8, %v576_v14, %v594_v11  ;;  %v513_v19 = vsub.f32 2.0, %v505_v16 }
 0x174   : > { %v598_v20 = vsel %vm597_vm9, %v580_v12, %v596_v18 }
 0x175   : > { %v521_v21 = vmul.f32 %v1402_v9, %v513_v19  ;;  %v600_v22 = vsel %vm599_vm10, %v584_v17, %v598_v20 }
 0x177   : > { %v588_v1 = vrot.slane %v521_v21, %v559_v37  ;;  %v628_v37 = vsub.s32 2, %v1731_v27 }
 0x178   : > { %1280 = vmatmul.mubr.msk.bf16.vlgmr.msra.gmra.mrb[4].mxu1 %vm851_vm12, %v842_v39 }
 0x179   : > { %v602_v26 = vsel %vm601_vm11, %v588_v1, %v600_v22  ;;  %1291 = vmatprep.mubr.msk.bf16.mxu1 %vm1492_vm3, %v1491_v25  ;;  %1290 = vmatpush3.bf16.msra.mxu1 %v1368_v51  ;;  %v539_v25 = vld [vmem:[#allocation3] sm:$0xff] }
 0x17a   : > { %v604_v28 = vmul.f32 %v1727_v15, %v602_v26  ;;  %v839_v15 = vpop.f32.mrb[2].mxu0  ;;  %v540_v57 = vmul.f32 %v1404_v46, %v539_v25 }
 0x17b   : > { %v1270_v38 = vpop.f32.mrb[3].mxu0 }
 0x17c   : > { %v622_v35 = vrot.slane %v604_v28, %v621_v4  ;;  %v615_v34 = vrot.slane %v604_v28, %v614_v24  ;;  %v657_v40 = vrot.slane %v604_v28, %v656_v36  ;;  %v629_v41 = vrot.slane %v604_v28, %v628_v37 }
 0x17d   : > { %v636_v44 = vrot.slane %v604_v28, %v635_v42  ;;  %v643_v48 = vrot.slane %v604_v28, %v642_v45  ;;  %v650_v52 = vrot.slane %v604_v28, %v649_v49  ;;  %v664_v56 = vrot.slane %v604_v28, %v663_v54 }
 0x17e   : > { %624 = vbcast.lane.b32.xlu1 %v622_v35, 256  ;;  %617 = vbcast.lane.b32.xlu0 %v615_v34, 256 }
 0x180   : > { %1292 = vmatmul.mubr.msk.bf16.vlgmr.msra.gmra.mrb[8].mxu1 %vm851_vm12, %v842_v39 }
 0x182   : > { %659 = vbcast.lane.b32.xlu1 %v657_v40, 256  ;;  %631 = vbcast.lane.b32.xlu0 %v629_v41, 256 }
 0x186   : > { %608 = vperm.xlu1 %1357, %v1404_v46   ;;  %638 = vbcast.lane.b32.xlu0 %v636_v44, 256 }
 0x18a   : > { %645 = vbcast.lane.b32.xlu0 %v643_v48, 256  ;;  %769 = vperm.xlu1 %1357, %v766_v47  }
 0x18e   : > { %652 = vbcast.lane.b32.xlu0 %v650_v52, 256 }
 0x192   : > { %666 = vbcast.lane.b32.xlu0 %v664_v56, 256 }
 0x1cb   : > { %v543_v58 = vpop.xlane.xlu0 %542 }
 0x1cc   : > { %v544_v59 = vadd.f32 %v543_v58, %v540_v57 }
 0x1ce   : > { %546 = vst.msk [vmem:[#allocation3] sm:$0xff] %vm394_vm0, %v544_v59 }
 0x1d5   : > { %v754_v60 = vld [vmem:[#allocation3] sm:$0xff] }
 0x1d6   : > { %1405 = vrcp.f32 %v754_v60 }
 0x1e0   : > { %v1406_v62 = vpop.eup %1405 }
 0x1e1   : > { %v756_v63 = vmul.f32 %v1406_v62, %v754_v60 }
 0x1e3   : > { %v757_v27 = vsub.f32 2.0, %v756_v63 }
 0x1e5   : > { %v758_v2 = vmul.f32 %v1406_v62, %v757_v27 }
 0x1e7   : > { %762 = vperm.xlu0 %1358, %v758_v2  }
 0x1eb   : > { %1359 = vset.pattern.permute.xlu0 %v1493_v6 }
 0x1f0   : > { %v625_v8 = vpop.permute.xlu1 %624  ;;  %v618_v9 = vpop.permute.xlu0 %617 }
 0x1f1   : > { %v669_v11 = vmul.f32 %v1691_v53, %v625_v8  ;;  %v668_v12 = vmul.f32 %v1693_v55, %v618_v9 }
 0x1f3   : > { %v683_v13 = vsel %vm397_vm2, %v669_v11, 0.0  ;;  %v676_v14 = vsel %vm397_vm2, %v668_v12, 0.0 }
 0x1f4   : > { %v684_v16 = vrot.slane %v683_v13, 4  ;;  %v677_v17 = vrot.slane %v676_v14, 4  ;;  %v660_v18 = vpop.permute.xlu1 %659  ;;  %v632_v19 = vpop.permute.xlu0 %631 }
 0x1f5   : > { %v670_v20 = vmul.f32 %v1701_v61, %v632_v19  ;;  %v674_v21 = vmul.f32 %v1715_v7, %v660_v18 }
 0x1f6   : > { %v685_v22 = vadd.f32 %v684_v16, %v683_v13  ;;  %v678_v1 = vadd.f32 %v677_v17, %v676_v14 }
 0x1f7   : > { %v690_v23 = vsel %vm397_vm2, %v670_v20, 0.0  ;;  %v718_v24 = vsel %vm397_vm2, %v674_v21, 0.0  ;;  %v605_v20 = vld [vmem:[#allocation4] sm:$0xff] }
 0x1f8   : > { %v691_v4 = vrot.slane %v690_v23, 4  ;;  %v639_v53 = vpop.permute.xlu0 %638  ;;  %v686_v28 = vrot.slane %v685_v22, 2  ;;  %v679_v31 = vrot.slane %v678_v1, 2  ;;  %v719_v30 = vrot.slane %v718_v24, 4 }
 0x1f9   : > { %v671_v55 = vmul.f32 %v1705_v0, %v639_v53 }
 0x1fa   : > { %v692_v26 = vadd.f32 %v691_v4, %v690_v23  ;;  %v687_v35 = vadd.f32 %v686_v28, %v685_v22  ;;  %v680_v37 = vadd.f32 %v679_v31, %v678_v1  ;;  %v720_v38 = vadd.f32 %v719_v30, %v718_v24 }
 0x1fb   : > { %v697_v29 = vsel %vm397_vm2, %v671_v55, 0.0 }
 0x1fc   : > { %v646_v32 = vpop.permute.xlu0 %645  ;;  %v693_v61 = vrot.slane %v692_v26, 2  ;;  %v698_v33 = vrot.slane %v697_v29, 4  ;;  %v688_v43 = vrot.slane %v687_v35, 1  ;;  %v681_v46 = vrot.slane %v680_v37, 1 }
 0x1fd   : > { %v672_v7 = vmul.f32 %v1711_v5, %v646_v32  ;;  %v721_v49 = vrot.slane %v720_v38, 2 }
 0x1fe   : > { %v699_v34 = vadd.f32 %v698_v33, %v697_v29  ;;  %v694_v39 = vadd.f32 %v693_v61, %v692_v26  ;;  %v689_v25 = vadd.f32 %v688_v43, %v687_v35 }
 0x1ff   : > { %v704_v36 = vsel %vm397_vm2, %v672_v7, 0.0  ;;  %v722_v62 = vadd.f32 %v721_v49, %v720_v38 }
 0x200   : > { %v705_v15 = vrot.slane %v704_v36, 4  ;;  %v653_v0 = vpop.permute.xlu0 %652  ;;  %v700_v40 = vrot.slane %v699_v34, 2  ;;  %v695_v50 = vrot.slane %v694_v39, 1 }
 0x201   : > { %v673_v41 = vmul.f32 %v1709_v3, %v653_v0  ;;  %v682_v3 = vadd.f32 %v681_v46, %v680_v37  ;;  %v723_v12 = vrot.slane %v722_v62, 1 }
 0x202   : > { %v706_v42 = vadd.f32 %v705_v15, %v704_v36  ;;  %v701_v44 = vadd.f32 %v700_v40, %v699_v34  ;;  %v696_v63 = vadd.f32 %v695_v50, %v694_v39 }
 0x203   : > { %v711_v45 = vsel %vm397_vm2, %v673_v41, 0.0  ;;  %v740_v9 = vsel %vm589_vm5, %v689_v25, %v682_v3  ;;  %v724_v23 = vadd.f32 %v723_v12, %v722_v62  ;;  %v1227_v25 = vld [vmem:[%s1871_s7] ss:$0 sm:$0xff] }
 0x204   : > { %v707_v47 = vrot.slane %v706_v42, 2  ;;  %v712_v5 = vrot.slane %v711_v45, 4  ;;  %v667_v48 = vpop.permute.xlu0 %666  ;;  %v702_v52 = vrot.slane %v701_v44, 1  ;;  %v741_v13 = vsel %vm591_vm6, %v696_v63, %v740_v9 }
 0x205   : > { %v675_v51 = vmul.f32 %v1721_v10, %v667_v48  ;;  %v609_v21 = vpop.permute.xlu1 %608 }
 0x206   : > { %v708_v54 = vadd.f32 %v707_v47, %v706_v42  ;;  %v713_v56 = vadd.f32 %v712_v5, %v711_v45  ;;  %v703_v27 = vadd.f32 %v702_v52, %v701_v44  ;;  %v611_v4 = vmul.f32 %v609_v21, %v605_v20 }
 0x207   : > { %v725_v57 = vsel %vm397_vm2, %v675_v51, 0.0  ;;  %v1494_v44 = vmov 2   ;;  %v1495_v45 = vmov 3  }
 0x208   : > { %v709_v58 = vrot.slane %v708_v54, 1  ;;  %v714_v59 = vrot.slane %v713_v56, 2  ;;  %v726_v60 = vrot.slane %v725_v57, 4  ;;  %v742_v14 = vsel %vm593_vm7, %v703_v27, %v741_v13 }
 0x209   : > { %v770_v42 = vpop.permute.xlu1 %769 }
 0x20a   : > { %v715_v2 = vadd.f32 %v714_v59, %v713_v56  ;;  %v727_v6 = vadd.f32 %v726_v60, %v725_v57  ;;  %v710_v8 = vadd.f32 %v709_v58, %v708_v54 }
 0x20c   : > { %v716_v11 = vrot.slane %v715_v2, 1  ;;  %v728_v10 = vrot.slane %v727_v6, 2  ;;  %v743_v18 = vsel %vm595_vm8, %v710_v8, %v742_v14 }
 0x20e   : > { %v717_v16 = vadd.f32 %v716_v11, %v715_v2  ;;  %v729_v17 = vadd.f32 %v728_v10, %v727_v6 }
 0x210   : > { %v730_v19 = vrot.slane %v729_v17, 1  ;;  %v744_v22 = vsel %vm597_vm9, %v717_v16, %v743_v18 }
 0x211   : > { %v745_v53 = vsel %vm599_vm10, %v724_v23, %v744_v22 }
 0x212   : > { %v731_v1 = vadd.f32 %v730_v19, %v729_v17 }
 0x214   : > { %v746_v55 = vsel %vm601_vm11, %v731_v1, %v745_v53 }
 0x215   : > { %v748_v24 = vadd.f32 %v746_v55, %v611_v4 }
 0x217   : > { %749 = vst.msk [vmem:[#allocation4] sm:$0xff] %vm397_vm2, %v748_v24 }
 0x21e   : > { %v759_v38 = vld [vmem:[#allocation4] sm:$0xff] }
 0x243   : > { %v889_v26 = vpop.f32.mrb[0].mxu1  ;;  %v998_v7 = vpop.f32.mrb[4].mxu0 }
 0x244   : > { %v1275_v28 = vpop.f32.mrb[1].mxu1  ;;  %v1287_v34 = vpop.f32.mrb[5].mxu0 }
 0x245   : > { %v892_v29 = vpop.f32.mrb[2].mxu1  ;;  %v1001_v37 = vpop.f32.mrb[6].mxu0 }
 0x246   : > { %v1276_v31 = vpop.f32.mrb[3].mxu1  ;;  %v1288_v0 = vpop.f32.mrb[7].mxu0 }
 0x24b   : > { %v944_v32 = vpop.f32.mrb[4].mxu1 }
 0x24c   : > { %v1281_v30 = vpop.f32.mrb[5].mxu1 }
 0x24d   : > { %v947_v61 = vpop.f32.mrb[6].mxu1 }
 0x24e   : > { %v1282_v33 = vpop.f32.mrb[7].mxu1 }
 0x253   : > { %v1052_v35 = vpop.f32.mrb[8].mxu1 }
 0x254   : > { %v1293_v36 = vpop.f32.mrb[9].mxu1 }
 0x255   : > { %v1055_v15 = vpop.f32.mrb[10].mxu1 }
 0x256   : > { %v1294_v40 = vpop.f32.mrb[11].mxu1 }
 0x266   : > { %v763_v39 = vpop.permute.xlu0 %762 }
 0x267   : > { %v765_v41 = vmul.f32 %v763_v39, %v759_v38 }
 0x269   : > { %v772_v43 = vmul.f32 %v770_v42, %v765_v41 }
 0x26b   : > { %951 = vperm.xlu0 %1359, %v772_v43   ;;  %897 = vperm.xlu1 %1357, %v772_v43  }
 0x26f   : > { %1360 = vset.pattern.permute.xlu1 %v1494_v44  ;;  %1362 = vset.pattern.permute.xlu0 %v1495_v45 }
 0x270   : > { %1005 = vperm.xlu1 %1360, %v772_v43  }
 0x274   : > { %1361 = vset.pattern.permute.xlu1 %v1495_v45 }
 0x275   : > { %1059 = vperm.xlu1 %1361, %v772_v43  }
 0x2ea   : > { %v952_v46 = vpop.permute.xlu0 %951  ;;  %v898_v47 = vpop.permute.xlu1 %897 }
 0x2eb   : > { %v954_v5 = vmul.f32 %v952_v46, %v944_v32  ;;  %v900_v48 = vmul.f32 %v898_v47, %v889_v26 }
 0x2ed   : > { %v955_v49 = vadd.f32 %v954_v5, %v900_v48 }
 0x2ef   : > { %v1006_v50 = vpop.permute.xlu1 %1005 }
 0x2f0   : > { %v1008_v51 = vmul.f32 %v1006_v50, %v998_v7 }
 0x2f2   : > { %v1009_v52 = vadd.f32 %v1008_v51, %v955_v49 }
 0x2f4   : > { %v1060_v54 = vpop.permute.xlu1 %1059 }
 0x2f5   : > { %v1062_v56 = vmul.f32 %v1060_v54, %v1052_v35 }
 0x2f7   : > { %v1063_v57 = vadd.f32 %v1062_v56, %v1009_v52 }
 0x2f9   : > { %v1071_v3 = vadd.f32 %v1227_v25, %v1063_v57 }
 0x2fb   : > { %v1073_v58 = vmul.f32 0.70710677, %v1071_v3  ;;  %v1072_v60 = vmul.f32 0.5, %v1071_v3 }
 0x2fd   : > { %1407 = verf.f32 %v1073_v58 }
 0x307   : > { %v1408_v59 = vpop.eup %1407 }
 0x308   : > { %v1075_v62 = vadd.f32 1.0, %v1408_v59 }
 0x30a   : > { %v1076_v63 = vmul.f32 %v1075_v62, %v1072_v60 }
 0x30c   : > { %1077 = vst.msk [vmem:[%s365_s21] sm:$0xff] %vm798_vm4, %v1076_v63 }
 0x30d   : > { %1422 = shalt.err (!%p1419_p5)
}
 0x30e   : > { %s1423_s12 = scalar_lea.hbm %s1816_s24, 128  ;;  %s1427_s21 = scalar_lea.hbm %s1872_s8, 256 }
 0x30f   : > { %p1424_p6 = scmp.ne.s32.totalorder %s1816_s24, %s1423_s12  ;;  %p1428_p10 = scmp.lt.u32.totalorder %s1816_s24, %s1872_s8 }
 0x310   : > { %p1429_p11 = scmp.lt.u32.totalorder %s1427_s21, %s1423_s12  ;;  %p1431_p13 = scmp.lt.u32.totalorder %s1423_s12, %s1816_s24 }
 0x311   : > { %p1425_p7 = pnand %p1424_p6, %p1582_p4 }
 0x312   : > { %p1430_p12 = por %p1429_p11, %p1428_p10 }
 0x313   : > { %p1426_p9 = pneg %p1425_p7 }
 0x314   : > { %p1432_p0 = por %p1431_p13, %p1430_p12 }
 0x316   : > { %p1433_p1 = pnand %p1432_p0, %p1426_p9 }
 0x318   : > { %1436 = shalt.err (!%p1433_p1)
}
 0x319   : > { %1295 = dma.vmem_to_hbm [thread:$0]  (%p1582_p4), %s1818_s22, 128, %s1816_s24, %s1079_s16  }
 0x31a PF: > { %p1301_p2 = scmp.ge.s32.totalorder %s1487_s10, 2  ;;  %s1104_s25 = sand.u32 1, %s1467_s27  }
 0x31b   : > { %s1105_s30 = scalar_lea.sflag [#allocation6], %s1104_s25 }
 0x31c   : > { %p1298_p3 = pnand %p1301_p2, %p1589_p8 }
 0x31e   : > { %1462 = dma.done.wait (!%p1298_p3), %s1105_s30, 128  }
 0x31f   : > { %1464 = vsyncadd (!%p1298_p3), %s1105_s30, 4294967168  ;;  %s21_s10 = sadd.s32 1, %s1487_s10   ;;  %s1875_s27 = smov %s1471_s28 }
 0x320   : > { %p18_p5 = scmp.ge.s32.totalorder %s21_s10, 4   ;;  %s1876_s28 = smov %s1475_s29 }
 0x321   : > { %s1877_s29 = smov %s1595_s18  ;;  %s1878_s30 = smov %s1483_s9 }
 0x322   : > { %s1879_s9 = smov %s1881_s13  ;;  %20 = sbr.rel (!%p18_p5) target bundleno = 4 (0x4), region = 104 }
 0x329   :  { %1110 = vsyncpa [#allocation6], 1 }
 0x32a   :  { %1112 = vsyncpa [#allocation6 + $0x1], 1 }

</bundles_post_ra>
